<compile_context>
chip_gen: v7x
topology: tpu7x:2x2x1
jax: 0.10.0
libtpu: 0.0.40
codegen_flags: <defaults>
</compile_context>

<pallas_src>
from functools import partial

import jax
import jax.numpy as jnp
from jax import lax
from jax.experimental import pallas as pl
from jax.experimental.pallas import tpu as pltpu

LANE = 128
SUBLANE = 8


def _round_up(x, m):
    return (x + m - 1) // m * m


# ---------------------- one-time on-device feature probes ------------------- #
# Tiny pallas_calls executed once (outside jit) so the main kernel is correct
# and degrades gracefully across Mosaic revisions:
#   * _probe_roll_mode(dtype): rotate-direction convention of pltpu.roll
#     ("jnp" == jnp.roll semantics, "inv" == opposite), or None if roll cannot
#     be used for that dtype (the kernel then falls back to sublane slices).
#   * _single_buffer_ok(): whether pipeline_mode=pl.Buffered(1) is accepted
#     (used to keep grid-invariant weights single-buffered in VMEM).

_ROLL_MODE_CACHE = {}
_SINGLE_BUF_OK = None


def _probe_roll_mode(dtype):
    key = jnp.dtype(dtype).name
    if key not in _ROLL_MODE_CACHE:
        try:
            def probe(x_ref, o_ref):
                o_ref[...] = pltpu.roll(x_ref[...], 1, axis=0)

            x = lax.broadcasted_iota(dtype, (SUBLANE, LANE), 0)
            out = pl.pallas_call(
                probe,
                out_shape=jax.ShapeDtypeStruct((SUBLANE, LANE), jnp.dtype(dtype)),
            )(x)
            first = float(out[0, 0])
            if first == float(SUBLANE - 1):
                mode = "jnp"        # out[j] = x[(j - shift) % n]
            elif first == 1.0:
                mode = "inv"        # out[j] = x[(j + shift) % n]
            else:
                mode = None
        except Exception:           # pragma: no cover - defensive fallback
            mode = None
        _ROLL_MODE_CACHE[key] = mode
    return _ROLL_MODE_CACHE[key]


def _single_buffer_ok():
    global _SINGLE_BUF_OK
    if _SINGLE_BUF_OK is None:
        try:
            def k(x_ref, o_ref):
                o_ref[...] = x_ref[...]

            x = jnp.zeros((SUBLANE, LANE), jnp.float32)
            out = pl.pallas_call(
                k,
                grid=(1,),
                in_specs=[pl.BlockSpec((SUBLANE, LANE), lambda i: (0, 0),
                                       pipeline_mode=pl.Buffered(1))],
                out_specs=pl.BlockSpec((SUBLANE, LANE), lambda i: (0, 0)),
                out_shape=jax.ShapeDtypeStruct((SUBLANE, LANE), jnp.float32),
            )(x)
            jax.block_until_ready(out)
            _SINGLE_BUF_OK = True
        except Exception:           # pragma: no cover - defensive fallback
            _SINGLE_BUF_OK = False
    return _SINGLE_BUF_OK


# ------------------------------- Pallas kernel ------------------------------ #

def _fused_block_kernel(xa_ref, xb_ref, w1_ref, b1_ref, w2_ref, b2_ref, *rest,
                        K, dilation, TL, HB, H, pad, L, apply_relu2,
                        separate_downsample, fuse_downsample, compute_dtype,
                        roll_mode):
    """Fused TCN residual block for one (batch, L-tile) grid cell.

    xa_ref: (1, TL, Cp_in)   main input rows   [i*TL, i*TL+TL)        (padded coords)
    xb_ref: (1, HB, Cp_in)   trailing halo rows [(i+1)*TL, (i+1)*TL+HB)
    w1_ref: (K*Cp_in,  Cp_mid)          tap-stacked conv1 weight
    w2_ref: (K*Cp_mid[+Cp_in], Cp_out)  tap-stacked conv2 weight (+ fused Wd)
    rest  : (wd_ref, bd_ref, o_ref) if separate_downsample else (o_ref,)
    """
    if separate_downsample:
        wd_ref, bd_ref, o_ref = rest
    else:
        (o_ref,) = rest

    i = pl.program_id(1)           # L-tile index
    rows = TL + HB                 # stitched window height (multiple of 8)
    lh = TL + H                    # h rows actually consumed by conv2

    def window(x, s, n):
        """Rows r in [0, n) of the result equal x[r + s] (s, n static)."""
        if s == 0:
            return x if n == x.shape[0] else x[:n]
        if roll_mode is None:                      # portable fallback: sublane slice
            return x[s:s + n]
        amt = (x.shape[0] - s) if roll_mode == "jnp" else s
        y = pltpu.roll(x, amt, axis=0)             # XLU rotate along sublanes
        return y if n == x.shape[0] else y[:n]

    # Halo'd input window for this tile, stitched in VMEM, cast to the MXU
    # compute dtype ONCE (before the K shifted copies are built).
    x_win = jnp.concatenate([xa_ref[0], xb_ref[0]], axis=0)     # (rows, Cp_in)
    x_c = x_win.astype(compute_dtype)

    # ---- conv1 + bias + ReLU: one (n_h, K*Cin) @ (K*Cin, Cmid) MXU matmul ----
    n_h = rows if roll_mode is not None else lh
    x_tap = [window(x_c, k * dilation, n_h) for k in range(K)]
    h = jnp.dot(jnp.concatenate(x_tap, axis=1), w1_ref[...],
                preferred_element_type=jnp.float32)
    h = jnp.maximum(h + b1_ref[...], 0.0)          # relu1; dropout1 = identity (eval)

    # conv2 must see zeros wherever conv1's output falls outside [0, L).
    # (Kept unconditional: one (n_h, Cmid) select is cheap next to the matmuls.)
    r = lax.broadcasted_iota(jnp.int32, (n_h, 1), 0)
    s_glob = i * TL - pad + r
    h = jnp.where((s_glob >= 0) & (s_glob < L), h, 0.0)
    h_c = h.astype(compute_dtype)                  # cast once before the shifts

    # ---- conv2 (+ fused 1x1 downsample) as one MXU matmul over stacked taps ----
    lhs = [window(h_c, k * dilation, TL) for k in range(K)]
    # Input rows [i*TL, i*TL+TL) (residual rows) == first TL rows of the last
    # x tap (shift H = (K-1)*dilation): reuse it instead of re-slicing.
    x_res_c = x_tap[K - 1][:TL]
    if fuse_downsample:
        lhs.append(x_res_c)        # Wd is stacked under W2, bd folded into b2
    out = jnp.dot(jnp.concatenate(lhs, axis=1), w2_ref[...],
                  preferred_element_type=jnp.float32)
    out = out + b2_ref[...]
    if apply_relu2:                                # skipped when is_last
        out = jnp.maximum(out, 0.0)                # dropout2 = identity (eval)

    # ---- residual path + final ReLU ----
    if fuse_downsample:
        pass                                       # residual already inside `out`
    elif separate_downsample:
        out = out + (jnp.dot(x_res_c, wd_ref[...],
                             preferred_element_type=jnp.float32) + bd_ref[...])
    else:
        # identity residual kept in the input dtype (exact)
        out = out + window(x_win, H, TL).astype(jnp.float32)
    o_ref[0] = jnp.maximum(out, 0.0).astype(o_ref.dtype)


# ----------------------------- parameter prep ------------------------------- #

def _weight_norm(v, g):
    """PyTorch weight_norm for Conv1d (dim=0): w[o] = g[o] * v[o] / ||v[o]||."""
    norm = jnp.sqrt(jnp.sum(v * v, axis=(1, 2), keepdims=True))
    norm = jnp.maximum(norm, 1e-12)
    return v * (g.reshape(-1, 1, 1) / norm)


def prepare_residual_block_params(params, *, kernel_size, dilation, is_last=False,
                                  compute_dtype=jnp.bfloat16):
    """Fold weight-norm, stack conv taps (and the 1x1 downsample when it can be
    fused), pad channels to 128 lanes, and cast weights to the MXU dtype.

    In a stacked TCN this runs once per block at model setup, outside the
    per-step forward path.
    """
    K = kernel_size
    assert (K - 1) * dilation % 2 == 0, \
        "(kernel_size-1)*dilation must be even for PyTorch 'same'-style padding"

    w1 = _weight_norm(params["v1"], params["g1"])   # (Cout, Cin, K)
    w2 = _weight_norm(params["v2"], params["g2"])   # (Cout, Cout, K)
    Cout, Cin, _ = w1.shape
    cp_in, cp_mid = _round_up(Cin, LANE), _round_up(Cout, LANE)
    cp_out = cp_mid

    def pack(w, ci_p, co_p):                        # (Co, Ci, K) -> (K*ci_p, co_p)
        Co, Ci, Kw = w.shape
        wt = jnp.transpose(w, (2, 1, 0))            # (K, Ci, Co)
        wt = jnp.pad(wt, ((0, 0), (0, ci_p - Ci), (0, co_p - Co)))
        return wt.reshape(Kw * ci_p, co_p)

    def pad_bias(b, co_p):
        return jnp.pad(b, (0, co_p - b.shape[0])).reshape(1, co_p).astype(jnp.float32)

    has_down = params.get("w_down") is not None
    if not has_down:
        assert Cin == Cout, "no downsample conv requires in_channels == out_channels"
    # relu2 is skipped when is_last, so the 1x1 downsample can ride in conv2's
    # contraction: W2 <- [W2; Wd], b2 <- b2 + bd  (one matmul instead of two).
    fuse_down = has_down and is_last

    W2 = pack(w2, cp_mid, cp_out)
    b2 = pad_bias(params["b2"], cp_out)
    Wd = bd = None
    if has_down:
        Wd_p = jnp.pad(jnp.transpose(params["w_down"][:, :, 0], (1, 0)),
                       ((0, cp_in - Cin), (0, cp_out - Cout)))
        bd_p = pad_bias(params["b_down"], cp_out)
        if fuse_down:
            W2 = jnp.concatenate([W2, Wd_p], axis=0)
            b2 = b2 + bd_p
        else:
            Wd, bd = Wd_p.astype(compute_dtype), bd_p

    return {
        "W1": pack(w1, cp_in, cp_mid).astype(compute_dtype),
        "b1": pad_bias(params["b1"], cp_mid),
        "W2": W2.astype(compute_dtype), "b2": b2, "Wd": Wd, "bd": bd,
        "cin": Cin, "cout": Cout,
        "cp_in": cp_in, "cp_mid": cp_mid, "cp_out": cp_out,
        "K": K, "dilation": dilation, "is_last": is_last,
        "fuse_down": fuse_down, "compute_dtype": compute_dtype,
    }


# ------------------------------ pallas_call glue ---------------------------- #

def _pick_tile_len(N, L, HB, target, est_bytes, budget):
    """Largest L-tile (multiple of HB) under the VMEM budget.  When N == 1 also
    ensure >= 2 (preferably an even number of) tiles so both v7x TensorCores
    get work; v5e/v6e (1 TC) are unaffected."""
    TL = min(_round_up(L, HB), _round_up(target, HB))
    while TL > HB and est_bytes(TL) > budget:
        TL -= HB
    if N == 1 and L > HB:
        while TL > HB and -(-L // TL) < 2:
            TL -= HB
        TL_even = TL
        while TL_even > max(HB, TL // 2) and (-(-L // TL_even)) % 2 == 1:
            TL_even -= HB
        if (-(-L // TL_even)) % 2 == 0:
            TL = TL_even
    return TL


def residual_block_apply_nlc(x_nlc, prep, *, tile_target=2048,
                             vmem_limit_bytes=48 * 1024 * 1024,
                             out_dtype=None, crop_output=True):
    """x_nlc: (N, L, Cin) [or already lane-padded (N, L, cp_in)] -> (N, L, Cout).

    With crop_output=False the lane-padded, L-padded (N, Lgrid, cp_out) slab is
    returned, so stacked blocks can skip the per-block HBM crop copy and crop
    once at the model boundary (the caller must track the true L).
    For bandwidth-bound stacks (small true C, v5e), pass out_dtype=jnp.bfloat16
    to carry activations in bf16.
    """
    N, L, Cin = x_nlc.shape
    K, d = prep["K"], prep["dilation"]
    cp_in, cp_mid, cp_out = prep["cp_in"], prep["cp_mid"], prep["cp_out"]
    assert Cin in (prep["cin"], cp_in), (Cin, prep["cin"], cp_in)
    out_dtype = x_nlc.dtype if out_dtype is None else out_dtype

    H = (K - 1) * d                    # total halo per side for the stacked convs
    pad = H // 2                       # per-conv padding (PyTorch semantics)
    HB = max(_round_up(2 * H, SUBLANE), SUBLANE)    # trailing halo block rows

    separate_down = prep["Wd"] is not None
    w1_rows, w2_rows = prep["W1"].shape[0], prep["W2"].shape[0]
    in_isz = jnp.dtype(x_nlc.dtype).itemsize
    out_isz = jnp.dtype(out_dtype).itemsize
    c_isz = jnp.dtype(prep["compute_dtype"]).itemsize

    def est_bytes(TL):                 # rough per-tile VMEM footprint
        rows = TL + HB
        io = 2 * (rows * cp_in * in_isz + TL * cp_out * out_isz)   # dbl-buffered tiles
        wb = (w1_rows * cp_mid + w2_rows * cp_out) * c_isz + (cp_mid + cp_out) * 4
        if separate_down:
            wb += cp_in * cp_out * c_isz + cp_out * 4
        live = rows * K * cp_in * c_isz + rows * cp_mid * (4 + c_isz)
        live += TL * w2_rows * c_isz + TL * cp_out * 4
        return io + wb + live          # weights single-buffered

    TL = _pick_tile_len(N, L, HB, tile_target, est_bytes,
                        int(0.8 * vmem_limit_bytes))
    nLt = -(-L // TL)
    Lgrid = nLt * TL
    ratio = TL // HB

    # Single fused pad: left halo zeros, right halo + tile padding, lane padding.
    rpad = Lgrid + HB - H - L
    xp = jnp.pad(x_nlc, ((0, 0), (H, rpad), (0, cp_in - Cin)))

    # Probe the roll convention for every dtype the kernel rotates; fall back to
    # sublane slices unless both agree on a usable mode.
    m_in = _probe_roll_mode(x_nlc.dtype)
    m_c = _probe_roll_mode(prep["compute_dtype"])
    roll_mode = m_in if (m_in == m_c and m_in is not None) else None

    kernel = partial(_fused_block_kernel, K=K, dilation=d, TL=TL, HB=HB, H=H,
                     pad=pad, L=L, apply_relu2=not prep["is_last"],
                     separate_downsample=separate_down,
                     fuse_downsample=prep["fuse_down"],
                     compute_dtype=prep["compute_dtype"], roll_mode=roll_mode)

    single_buf = _single_buffer_ok()

    def const_spec(shape):             # grid-invariant weights/biases
        if single_buf:
            return pl.BlockSpec(shape, lambda n, i: (0,) * len(shape),
                                pipeline_mode=pl.Buffered(1))
        return pl.BlockSpec(shape, lambda n, i: (0,) * len(shape))

    in_specs = [
        pl.BlockSpec((1, TL, cp_in), lambda n, i: (n, i, 0)),                 # main tile
        pl.BlockSpec((1, HB, cp_in), lambda n, i: (n, (i + 1) * ratio, 0)),   # halo tail
        const_spec((w1_rows, cp_mid)),                                        # W1
        const_spec((1, cp_mid)),                                              # b1
        const_spec((w2_rows, cp_out)),                                        # W2 (+Wd)
        const_spec((1, cp_out)),                                              # b2
    ]
    args = [xp, xp, prep["W1"], prep["b1"], prep["W2"], prep["b2"]]
    if separate_down:
        in_specs += [const_spec((cp_in, cp_out)), const_spec((1, cp_out))]
        args += [prep["Wd"], prep["bd"]]

    out = pl.pallas_call(
        kernel,
        out_shape=jax.ShapeDtypeStruct((N, Lgrid, cp_out), out_dtype),
        grid=(N, nLt),
        in_specs=in_specs,
        out_specs=pl.BlockSpec((1, TL, cp_out), lambda n, i: (n, i, 0)),
        compiler_params=pltpu.CompilerParams(
            dimension_semantics=("parallel", "parallel"),
            vmem_limit_bytes=int(vmem_limit_bytes)),
    )(*args)

    if crop_output:
        return out[:, :L, :prep["cout"]]
    return out


def residual_block_forward(x_ncl, params, *, kernel_size, dilation, is_last=False,
                           compute_dtype=jnp.bfloat16, tile_target=2048,
                           vmem_limit_bytes=48 * 1024 * 1024):
    """PyTorch-interface wrapper: (N, Cin, L) -> (N, Cout, L), eval mode.

    The NCL<->NLC transposes and parameter prep below would be hoisted to the
    model boundary when stacking many blocks.
    """
    prep = prepare_residual_block_params(params, kernel_size=kernel_size,
                                         dilation=dilation, is_last=is_last,
                                         compute_dtype=compute_dtype)
    x_nlc = jnp.transpose(x_ncl, (0, 2, 1))
    out = residual_block_apply_nlc(x_nlc, prep, tile_target=tile_target,
                                   vmem_limit_bytes=vmem_limit_bytes)
    return jnp.transpose(out, (0, 2, 1))


# ------------------------------ pure-JAX reference -------------------------- #

def _ref_conv1d(x_ncl, w, b, dilation, padding):
    out = lax.conv_general_dilated(
        x_ncl, w, window_strides=(1,), padding=[(padding, padding)],
        rhs_dilation=(dilation,), dimension_numbers=("NCH", "OIH", "NCH"),
        precision=lax.Precision.HIGHEST)
    return out + b.reshape(1, -1, 1)


def residual_block_reference(x_ncl, params, *, kernel_size, dilation, is_last=False):
    padding = (kernel_size - 1) * dilation // 2
    w1 = _weight_norm(params["v1"], params["g1"])
    w2 = _weight_norm(params["v2"], params["g2"])
    out = jnp.maximum(_ref_conv1d(x_ncl, w1, params["b1"], dilation, padding), 0.0)
    out = _ref_conv1d(out, w2, params["b2"], dilation, padding)
    if not is_last:
        out = jnp.maximum(out, 0.0)
    if params.get("w_down") is not None:
        res = _ref_conv1d(x_ncl, params["w_down"], params["b_down"], 1, 0)
    else:
        res = x_ncl
    return jnp.maximum(out + res, 0.0)


# ----------------------------------- main ----------------------------------- #

def _check(name, out, ref, atol, rtol):
    assert out.shape == ref.shape, (name, out.shape, ref.shape)
    err = float(jnp.max(jnp.abs(out - ref)))
    assert jnp.allclose(out, ref, atol=atol, rtol=rtol), (name, err)


if __name__ == "__main__":
    kernel_size = 5
    key = jax.random.PRNGKey(0)
    ks = jax.random.split(key, 32)

    def make_params(keys, c_in, c_out, with_down):
        return {
            "v1": jax.random.normal(keys[0], (c_out, c_in, kernel_size), jnp.float32) * 0.2,
            "g1": jax.random.uniform(keys[1], (c_out,), jnp.float32, 0.5, 1.5),
            "b1": jax.random.normal(keys[2], (c_out,), jnp.float32) * 0.1,
            "v2": jax.random.normal(keys[3], (c_out, c_out, kernel_size), jnp.float32) * 0.2,
            "g2": jax.random.uniform(keys[4], (c_out,), jnp.float32, 0.5, 1.5),
            "b2": jax.random.normal(keys[5], (c_out,), jnp.float32) * 0.1,
            "w_down": (jax.random.normal(keys[6], (c_out, c_in, 1), jnp.float32) * 0.3
                       if with_down else None),
            "b_down": (jax.random.normal(keys[7], (c_out,), jnp.float32) * 0.1
                       if with_down else None),
        }

    # --- case 1: Cin != Cout (separate 1x1 downsample), not last, dilation=2 ---
    params1 = make_params(ks[0:8], 4, 8, True)
    x1 = jax.random.normal(ks[8], (2, 4, 16), jnp.float32)
    ref1 = residual_block_reference(x1, params1, kernel_size=kernel_size,
                                    dilation=2, is_last=False)
    out1_f32 = jax.block_until_ready(residual_block_forward(
        x1, params1, kernel_size=kernel_size, dilation=2, is_last=False,
        compute_dtype=jnp.float32))
    _check("case1_f32", out1_f32, ref1, atol=2e-3, rtol=2e-3)
    out1_bf16 = jax.block_until_ready(residual_block_forward(
        x1, params1, kernel_size=kernel_size, dilation=2, is_last=False))
    _check("case1_bf16", out1_bf16, ref1, atol=5e-2, rtol=5e-2)

    # --- case 2: Cin == Cout (identity residual), is_last=True, dilation=2 ---
    params2 = make_params(ks[9:17], 8, 8, False)
    x2 = jax.random.normal(ks[17], (2, 8, 16), jnp.float32)
    ref2 = residual_block_reference(x2, params2, kernel_size=kernel_size,
                                    dilation=2, is_last=True)
    out2_f32 = jax.block_until_ready(residual_block_forward(
        x2, params2, kernel_size=kernel_size, dilation=2, is_last=True,
        compute_dtype=jnp.float32))
    _check("case2_f32", out2_f32, ref2, atol=2e-3, rtol=2e-3)
    out2_bf16 = jax.block_until_ready(residual_block_forward(
        x2, params2, kernel_size=kernel_size, dilation=2, is_last=True))
    _check("case2_bf16", out2_bf16, ref2, atol=5e-2, rtol=5e-2)

    # --- case 3: downsample fused into conv2 (is_last=True, Cin != Cout),
    #     dilation=1, N=1, L=20 (not a tile multiple): exercises the boundary
    #     mask, multi-tile halos and the N==1 two-TensorCore tile split ---
    params3 = make_params(ks[18:26], 4, 8, True)
    x3 = jax.random.normal(ks[26], (1, 4, 20), jnp.float32)
    ref3 = residual_block_reference(x3, params3, kernel_size=kernel_size,
                                    dilation=1, is_last=True)
    out3_f32 = jax.block_until_ready(residual_block_forward(
        x3, params3, kernel_size=kernel_size, dilation=1, is_last=True,
        compute_dtype=jnp.float32))
    _check("case3_f32", out3_f32, ref3, atol=2e-3, rtol=2e-3)
    out3_bf16 = jax.block_until_ready(residual_block_forward(
        x3, params3, kernel_size=kernel_size, dilation=1, is_last=True))
    _check("case3_bf16", out3_bf16, ref3, atol=5e-2, rtol=5e-2)

    print("KERNEL_OK")
</pallas_src>

<mosaic_0001>
module attributes {stable_mosaic.version = 11 : i64} {
  func.func @probe(%arg0: memref<8x128xf32, #tpu.memory_space<vmem>>, %arg1: memref<8x128xf32, #tpu.memory_space<vmem>>) attributes {dimension_semantics = [], scalar_prefetch = 0 : i64, scratch_operands = 0 : i64, tpu.core_type = #tpu.core_type<tc>} {
    %c0 = arith.constant 0 : index
    %c0_0 = arith.constant 0 : index
    %0 = vector.load %arg0[%c0, %c0_0] : memref<8x128xf32, #tpu.memory_space<vmem>>, vector<8x128xf32>
    %c1_i32 = arith.constant 1 : i32
    %1 = tpu.dynamic_rotate %0 by %c1_i32 dim 0 : vector<8x128xf32>, i32 -> vector<8x128xf32>
    %c0_1 = arith.constant 0 : index
    %c0_2 = arith.constant 0 : index
    %2 = vector.load %arg1[%c0_1, %c0_2] : memref<8x128xf32, #tpu.memory_space<vmem>>, vector<8x128xf32>
    tpu.vector_store %arg1[%c0_1, %c0_2], %1 {strides = array<i32>} : memref<8x128xf32, #tpu.memory_space<vmem>>, vector<8x128xf32>,
    return
  }
}

module attributes {stable_mosaic.version = 11 : i64} {
  func.func @k(%arg0: i32, %arg1: memref<8x128xf32, #tpu.memory_space<vmem>>, %arg2: memref<8x128xf32, #tpu.memory_space<vmem>>) attributes {dimension_semantics = [#tpu.dimension_semantics<arbitrary>], iteration_bounds = array<i64: 1>, scalar_prefetch = 0 : i64, scratch_operands = 0 : i64, tpu.core_type = #tpu.core_type<tc>, window_params = [{pipeline_mode = #tpu.pipeline_mode<synchronous>, transform_indices = @transform_0, window_bounds = array<i64: 8, 128>}, {pipeline_mode = #tpu.pipeline_mode<synchronous>, transform_indices = @transform_1, window_bounds = array<i64: 8, 128>}]} {
    %c0 = arith.constant 0 : index
    %c0_0 = arith.constant 0 : index
    %0 = vector.load %arg1[%c0, %c0_0] : memref<8x128xf32, #tpu.memory_space<vmem>>, vector<8x128xf32>
    %c0_1 = arith.constant 0 : index
    %c0_2 = arith.constant 0 : index
    %1 = vector.load %arg2[%c0_1, %c0_2] : memref<8x128xf32, #tpu.memory_space<vmem>>, vector<8x128xf32>
    tpu.vector_store %arg2[%c0_1, %c0_2], %0 {strides = array<i32>} : memref<8x128xf32, #tpu.memory_space<vmem>>, vector<8x128xf32>,
    return
  }
  func.func @transform_0(%arg0: i32) -> (i32, i32) {
    %c0_i32 = arith.constant 0 : i32
    %c0_i32_0 = arith.constant 0 : i32
    %c0_i32_1 = arith.constant 0 : i32
    return %c0_i32, %c0_i32_0 : i32, i32
  }
  func.func @transform_1(%arg0: i32) -> (i32, i32) {
    %c0_i32 = arith.constant 0 : i32
    %c0_i32_0 = arith.constant 0 : i32
    %c0_i32_1 = arith.constant 0 : i32
    return %c0_i32, %c0_i32_0 : i32, i32
  }
}

module attributes {stable_mosaic.version = 11 : i64} {
  func.func @_fused_block_kernel(%arg0: i32, %arg1: i32, %arg2: memref<1x16x128xf32, #tpu.memory_space<vmem>>, %arg3: memref<1x16x128xf32, #tpu.memory_space<vmem>>, %arg4: memref<640x128xf32, #tpu.memory_space<vmem>>, %arg5: memref<1x128xf32, #tpu.memory_space<vmem>>, %arg6: memref<640x128xf32, #tpu.memory_space<vmem>>, %arg7: memref<1x128xf32, #tpu.memory_space<vmem>>, %arg8: memref<128x128xf32, #tpu.memory_space<vmem>>, %arg9: memref<1x128xf32, #tpu.memory_space<vmem>>, %arg10: memref<1x16x128xf32, #tpu.memory_space<vmem>>) attributes {dimension_semantics = [#tpu.dimension_semantics<parallel>, #tpu.dimension_semantics<parallel>], iteration_bounds = array<i64: 2, 1>, scalar_prefetch = 0 : i64, scratch_operands = 0 : i64, tpu.core_type = #tpu.core_type<tc>, window_params = [{transform_indices = @transform_0, window_bounds = array<i64: 1, 16, 128>}, {transform_indices = @transform_1, window_bounds = array<i64: 1, 16, 128>}, {pipeline_mode = #tpu.pipeline_mode<synchronous>, transform_indices = @transform_2, window_bounds = array<i64: 640, 128>}, {pipeline_mode = #tpu.pipeline_mode<synchronous>, transform_indices = @transform_3, window_bounds = array<i64: 1, 128>}, {pipeline_mode = #tpu.pipeline_mode<synchronous>, transform_indices = @transform_4, window_bounds = array<i64: 640, 128>}, {pipeline_mode = #tpu.pipeline_mode<synchronous>, transform_indices = @transform_5, window_bounds = array<i64: 1, 128>}, {pipeline_mode = #tpu.pipeline_mode<synchronous>, transform_indices = @transform_6, window_bounds = array<i64: 128, 128>}, {pipeline_mode = #tpu.pipeline_mode<synchronous>, transform_indices = @transform_7, window_bounds = array<i64: 1, 128>}, {transform_indices = @transform_8, window_bounds = array<i64: 1, 16, 128>}]} {
    %c0 = arith.constant 0 : index
    %c0_0 = arith.constant 0 : index
    %c0_1 = arith.constant 0 : index
    %0 = vector.load %arg2[%c0, %c0_0, %c0_1] : memref<1x16x128xf32, #tpu.memory_space<vmem>>, vector<1x16x128xf32>
    %1 = vector.shape_cast %0 : vector<1x16x128xf32> to vector<16x128xf32>
    %c0_2 = arith.constant 0 : index
    %c0_3 = arith.constant 0 : index
    %c0_4 = arith.constant 0 : index
    %2 = vector.load %arg3[%c0_2, %c0_3, %c0_4] : memref<1x16x128xf32, #tpu.memory_space<vmem>>, vector<1x16x128xf32>
    %3 = vector.shape_cast %2 : vector<1x16x128xf32> to vector<16x128xf32>
    %4 = tpu.concatenate %1, %3 in 0 : vector<16x128xf32>, vector<16x128xf32> -> vector<32x128xf32>
    %5 = vector.extract_strided_slice %4 {offsets = [0, 0], sizes = [24, 128], strides = [1, 1]} : vector<32x128xf32> to vector<24x128xf32>
    %6 = vector.extract_strided_slice %4 {offsets = [2, 0], sizes = [24, 128], strides = [1, 1]} : vector<32x128xf32> to vector<24x128xf32>
    %7 = vector.extract_strided_slice %4 {offsets = [4, 0], sizes = [24, 128], strides = [1, 1]} : vector<32x128xf32> to vector<24x128xf32>
    %8 = vector.extract_strided_slice %4 {offsets = [6, 0], sizes = [24, 128], strides = [1, 1]} : vector<32x128xf32> to vector<24x128xf32>
    %9 = vector.extract_strided_slice %4 {offsets = [8, 0], sizes = [24, 128], strides = [1, 1]} : vector<32x128xf32> to vector<24x128xf32>
    %10 = tpu.concatenate %5, %6, %7, %8, %9 in 1 : vector<24x128xf32>, vector<24x128xf32>, vector<24x128xf32>, vector<24x128xf32>, vector<24x128xf32> -> vector<24x640xf32>
    %c0_5 = arith.constant 0 : index
    %c0_6 = arith.constant 0 : index
    %11 = vector.load %arg4[%c0_5, %c0_6] : memref<640x128xf32, #tpu.memory_space<vmem>>, vector<640x128xf32>
    %cst = arith.constant dense<0.000000e+00> : vector<24x128xf32>
    %12 = tpu.matmul %10, %11, %cst {dimension_numbers = #tpu.dot_dimension_numbers<[1], [0], [0], [1], [0, 0, 1, 1], [], []>} : vector<24x640xf32>, vector<640x128xf32>, vector<24x128xf32> -> vector<24x128xf32>
    %c0_7 = arith.constant 0 : index
    %c0_8 = arith.constant 0 : index
    %13 = vector.load %arg5[%c0_7, %c0_8] : memref<1x128xf32, #tpu.memory_space<vmem>>, vector<1x128xf32>
    %14 = vector.broadcast %13 : vector<1x128xf32> to vector<24x128xf32>
    %15 = arith.addf %12, %14 : vector<24x128xf32>
    %cst_9 = arith.constant 0.000000e+00 : f32
    %16 = vector.broadcast %cst_9 : f32 to vector<24x128xf32>
    %17 = arith.maximumf %15, %16 : vector<24x128xf32>
    %18 = tpu.iota {dimensions = array<i32: 0>} : vector<24x1xi32>
    %c16_i32 = arith.constant 16 : i32
    %19 = arith.muli %arg1, %c16_i32 : i32
    %c4_i32 = arith.constant 4 : i32
    %20 = arith.subi %19, %c4_i32 : i32
    %21 = vector.broadcast %20 : i32 to vector<24x1xi32>
    %22 = arith.addi %21, %18 : vector<24x1xi32>
    %c0_i32 = arith.constant 0 : i32
    %23 = vector.broadcast %c0_i32 : i32 to vector<24x1xi32>
    %24 = arith.cmpi sge, %22, %23 : vector<24x1xi32>
    %c16_i32_10 = arith.constant 16 : i32
    %25 = vector.broadcast %c16_i32_10 : i32 to vector<24x1xi32>
    %26 = arith.cmpi slt, %22, %25 : vector<24x1xi32>
    %27 = arith.andi %24, %26 : vector<24x1xi1>
    %cst_11 = arith.constant 0.000000e+00 : f32
    %28 = vector.shape_cast %27 : vector<24x1xi1> to vector<24x1xi1>
    %29 = vector.broadcast %28 : vector<24x1xi1> to vector<24x128xi1>
    %30 = vector.broadcast %cst_11 : f32 to vector<24x128xf32>
    %31 = arith.select %29, %17, %30 : vector<24x128xi1>, vector<24x128xf32>
    %32 = vector.extract_strided_slice %31 {offsets = [0, 0], sizes = [16, 128], strides = [1, 1]} : vector<24x128xf32> to vector<16x128xf32>
    %33 = vector.extract_strided_slice %31 {offsets = [2, 0], sizes = [16, 128], strides = [1, 1]} : vector<24x128xf32> to vector<16x128xf32>
    %34 = vector.extract_strided_slice %31 {offsets = [4, 0], sizes = [16, 128], strides = [1, 1]} : vector<24x128xf32> to vector<16x128xf32>
    %35 = vector.extract_strided_slice %31 {offsets = [6, 0], sizes = [16, 128], strides = [1, 1]} : vector<24x128xf32> to vector<16x128xf32>
    %36 = vector.extract_strided_slice %31 {offsets = [8, 0], sizes = [16, 128], strides = [1, 1]} : vector<24x128xf32> to vector<16x128xf32>
    %37 = vector.extract_strided_slice %9 {offsets = [0, 0], sizes = [16, 128], strides = [1, 1]} : vector<24x128xf32> to vector<16x128xf32>
    %38 = tpu.concatenate %32, %33, %34, %35, %36 in 1 : vector<16x128xf32>, vector<16x128xf32>, vector<16x128xf32>, vector<16x128xf32>, vector<16x128xf32> -> vector<16x640xf32>
    %c0_12 = arith.constant 0 : index
    %c0_13 = arith.constant 0 : index
    %39 = vector.load %arg6[%c0_12, %c0_13] : memref<640x128xf32, #tpu.memory_space<vmem>>, vector<640x128xf32>
    %cst_14 = arith.constant dense<0.000000e+00> : vector<16x128xf32>
    %40 = tpu.matmul %38, %39, %cst_14 {dimension_numbers = #tpu.dot_dimension_numbers<[1], [0], [0], [1], [0, 0, 1, 1], [], []>} : vector<16x640xf32>, vector<640x128xf32>, vector<16x128xf32> -> vector<16x128xf32>
    %c0_15 = arith.constant 0 : index
    %c0_16 = arith.constant 0 : index
    %41 = vector.load %arg7[%c0_15, %c0_16] : memref<1x128xf32, #tpu.memory_space<vmem>>, vector<1x128xf32>
    %42 = vector.broadcast %41 : vector<1x128xf32> to vector<16x128xf32>
    %43 = arith.addf %40, %42 : vector<16x128xf32>
    %cst_17 = arith.constant 0.000000e+00 : f32
    %44 = vector.broadcast %cst_17 : f32 to vector<16x128xf32>
    %45 = arith.maximumf %43, %44 : vector<16x128xf32>
    %c0_18 = arith.constant 0 : index
    %c0_19 = arith.constant 0 : index
    %46 = vector.load %arg8[%c0_18, %c0_19] : memref<128x128xf32, #tpu.memory_space<vmem>>, vector<128x128xf32>
    %cst_20 = arith.constant dense<0.000000e+00> : vector<16x128xf32>
    %47 = tpu.matmul %37, %46, %cst_20 {dimension_numbers = #tpu.dot_dimension_numbers<[1], [0], [0], [1], [0, 0, 1, 1], [], []>} : vector<16x128xf32>, vector<128x128xf32>, vector<16x128xf32> -> vector<16x128xf32>
    %c0_21 = arith.constant 0 : index
    %c0_22 = arith.constant 0 : index
    %48 = vector.load %arg9[%c0_21, %c0_22] : memref<1x128xf32, #tpu.memory_space<vmem>>, vector<1x128xf32>
    %49 = vector.broadcast %48 : vector<1x128xf32> to vector<16x128xf32>
    %50 = arith.addf %47, %49 : vector<16x128xf32>
    %51 = arith.addf %45, %50 : vector<16x128xf32>
    %cst_23 = arith.constant 0.000000e+00 : f32
    %52 = vector.broadcast %cst_23 : f32 to vector<16x128xf32>
    %53 = arith.maximumf %51, %52 : vector<16x128xf32>
    %c0_24 = arith.constant 0 : index
    %c0_25 = arith.constant 0 : index
    %c0_26 = arith.constant 0 : index
    %54 = vector.load %arg10[%c0_24, %c0_25, %c0_26] : memref<1x16x128xf32, #tpu.memory_space<vmem>>, vector<1x16x128xf32>
    %55 = vector.shape_cast %54 : vector<1x16x128xf32> to vector<16x128xf32>
    %56 = vector.shape_cast %53 : vector<16x128xf32> to vector<1x16x128xf32>
    tpu.vector_store %arg10[%c0_24, %c0_25, %c0_26], %56 {strides = array<i32>} : memref<1x16x128xf32, #tpu.memory_space<vmem>>, vector<1x16x128xf32>,
    return
  }
  func.func @transform_0(%arg0: i32, %arg1: i32) -> (i32, i32, i32) {
    %c0_i32 = arith.constant 0 : i32
    %c0_i32_0 = arith.constant 0 : i32
    return %arg0, %arg1, %c0_i32 : i32, i32, i32
  }
  func.func @transform_1(%arg0: i32, %arg1: i32) -> (i32, i32, i32) {
    %c1_i32 = arith.constant 1 : i32
    %0 = arith.addi %arg1, %c1_i32 : i32
    %c1_i32_0 = arith.constant 1 : i32
    %1 = arith.muli %0, %c1_i32_0 : i32
    %c0_i32 = arith.constant 0 : i32
    %c0_i32_1 = arith.constant 0 : i32
    return %arg0, %1, %c0_i32 : i32, i32, i32
  }
  func.func @transform_2(%arg0: i32, %arg1: i32) -> (i32, i32) {
    %c0_i32 = arith.constant 0 : i32
    %c0_i32_0 = arith.constant 0 : i32
    %c0_i32_1 = arith.constant 0 : i32
    return %c0_i32, %c0_i32_0 : i32, i32
  }
  func.func @transform_3(%arg0: i32, %arg1: i32) -> (i32, i32) {
    %c0_i32 = arith.constant 0 : i32
    %c0_i32_0 = arith.constant 0 : i32
    %c0_i32_1 = arith.constant 0 : i32
    return %c0_i32, %c0_i32_0 : i32, i32
  }
  func.func @transform_4(%arg0: i32, %arg1: i32) -> (i32, i32) {
    %c0_i32 = arith.constant 0 : i32
    %c0_i32_0 = arith.constant 0 : i32
    %c0_i32_1 = arith.constant 0 : i32
    return %c0_i32, %c0_i32_0 : i32, i32
  }
  func.func @transform_5(%arg0: i32, %arg1: i32) -> (i32, i32) {
    %c0_i32 = arith.constant 0 : i32
    %c0_i32_0 = arith.constant 0 : i32
    %c0_i32_1 = arith.constant 0 : i32
    return %c0_i32, %c0_i32_0 : i32, i32
  }
  func.func @transform_6(%arg0: i32, %arg1: i32) -> (i32, i32) {
    %c0_i32 = arith.constant 0 : i32
    %c0_i32_0 = arith.constant 0 : i32
    %c0_i32_1 = arith.constant 0 : i32
    return %c0_i32, %c0_i32_0 : i32, i32
  }
  func.func @transform_7(%arg0: i32, %arg1: i32) -> (i32, i32) {
    %c0_i32 = arith.constant 0 : i32
    %c0_i32_0 = arith.constant 0 : i32
    %c0_i32_1 = arith.constant 0 : i32
    return %c0_i32, %c0_i32_0 : i32, i32
  }
  func.func @transform_8(%arg0: i32, %arg1: i32) -> (i32, i32, i32) {
    %c0_i32 = arith.constant 0 : i32
    %c0_i32_0 = arith.constant 0 : i32
    return %arg0, %arg1, %c0_i32 : i32, i32, i32
  }
}

</mosaic_0001>

<bundles_post_ra>
// kernel: tpu_custom_call.1
= control target key start
LH: loop header
LB: loop body
LE: loop exit
PB: predicated region body
PF: predicated region fallthrough
CT: control target
= control target key end

     0   :  { %6 = vsyncpa [#allocation3], 0  ;;  %s125_s0 = inlined_call_operand.hbm [shape: f32[8,128], index: 0, kind: input, shape index: {}]   ;;  %s126_s1 = inlined_call_operand.hbm [shape: f32[8,128], index: 1, kind: output, shape index: {}]  }
   0x1   :  { %7 = vsyncpa [#allocation4], 0  ;;  %s89_s6 = smov [#allocation2]   ;;  %s41_s10 = scalar_lea.hbm %s125_s0, 128 }
   0x2   :  { %s14_s7 = sshll.u32 %s89_s6, 4  ;;  %p42_p0 = scmp.ne.s32.totalorder %s125_s0, %s41_s10  ;;  %s15_s7 = int_to_ptr.vmem [resolvable:$true] %s14_s7 }
   0x3   :  { %p45_p1 = scmp.lt.u32.totalorder %s41_s10, %s125_s0 }
   0x5   :  { %p47_p2 = pnand %p45_p1, %p42_p0 }
   0x7   :  { %50 = shalt.err (!%p47_p2)
}
   0x8   :  { %s51_s15 = scalar_lea.vmem %s15_s7, 128  ;;  %p56_p4 = scmp.lt.s32.totalorder %s15_s7, %s15_s7 }
   0x9   :  { %p52_p3 = scmp.ne.s32.totalorder %s15_s7, %s51_s15  ;;  %p57_p5 = scmp.lt.s32.totalorder %s51_s15, %s51_s15 }
   0xb   :  { %p58_p6 = por %p57_p5, %p56_p4 }
   0xd   :  { %p59_p7 = pnand %p58_p6, %p52_p3 }
   0xf   :  { %62 = shalt.err (!%p59_p7)
}
  0x10   :  { %17 = dma.hbm_to_vmem [thread:$0]  %s125_s0, 128, %s15_s7, [#allocation3]  }
  0x11   :  { %85 = dma.done.wait [#allocation3], 128  }
  0x12   :  { %86 = vsyncadd [#allocation3], 4294967168  ;;  %s90_s18 = smov [#allocation5]   ;;  %v21_v0 = vld [vmem:[#allocation2] sm:$0xff] }
  0x13   :  { %s30_s19 = sshll.u32 %s90_s18, 4  ;;  %v22_v1 = vrot.slane %v21_v0, 7  ;;  %s31_s19 = int_to_ptr.vmem [resolvable:$true] %s30_s19 }
  0x14   :  { %s63_s20 = scalar_lea.vmem %s31_s19, 128  ;;  %p68_p9 = scmp.lt.s32.totalorder %s31_s19, %s31_s19 }
  0x15   :  { %23 = vst [vmem:[#allocation5] sm:$0xff] %v22_v1  ;;  %p64_p8 = scmp.ne.s32.totalorder %s31_s19, %s63_s20  ;;  %p69_p10 = scmp.lt.s32.totalorder %s63_s20, %s63_s20 }
  0x17   :  { %p70_p11 = por %p69_p10, %p68_p9 }
  0x19   :  { %p71_p12 = pnand %p70_p11, %p64_p8 }
  0x1b   :  { %74 = shalt.err (!%p71_p12)
}
  0x1c   :  { %s75_s23 = scalar_lea.hbm %s126_s1, 128 }
  0x1d   :  { %p76_p13 = scmp.ne.s32.totalorder %s126_s1, %s75_s23  ;;  %p79_p0 = scmp.lt.u32.totalorder %s75_s23, %s126_s1 }
  0x1f   :  { %p81_p1 = pnand %p79_p0, %p76_p13 }
  0x21   :  { %84 = shalt.err (!%p81_p1)
}
  0x22   :  { %33 = dma.vmem_to_hbm [thread:$0]  %s31_s19, 128, %s126_s1, [#allocation4]  }
  0x23   :  { %87 = dma.done.wait [#allocation4], 128  }
  0x24   :  { %88 = vsyncadd [#allocation4], 4294967168 }
  0x25   :  { %37 = vsyncpa [#allocation3], 1 }
  0x26   :  { %38 = vsyncpa [#allocation4], 1 }

// kernel: tpu_custom_call.1
= control target key start
LH: loop header
LB: loop body
LE: loop exit
PB: predicated region body
PF: predicated region fallthrough
CT: control target
= control target key end

     0   :  { %6 = vsyncpa [#allocation3], 0  ;;  %s124_s0 = inlined_call_operand.hbm [shape: f32[8,128], index: 0, kind: input, shape index: {}]   ;;  %s125_s1 = inlined_call_operand.hbm [shape: f32[8,128], index: 1, kind: output, shape index: {}]  }
   0x1   :  { %7 = vsyncpa [#allocation4], 0  ;;  %s88_s6 = smov [#allocation2]   ;;  %s40_s10 = scalar_lea.hbm %s124_s0, 128 }
   0x2   :  { %s14_s7 = sshll.u32 %s88_s6, 4  ;;  %p41_p0 = scmp.ne.s32.totalorder %s124_s0, %s40_s10  ;;  %s15_s7 = int_to_ptr.vmem [resolvable:$true] %s14_s7 }
   0x3   :  { %p44_p1 = scmp.lt.u32.totalorder %s40_s10, %s124_s0 }
   0x5   :  { %p46_p2 = pnand %p44_p1, %p41_p0 }
   0x7   :  { %49 = shalt.err (!%p46_p2)
}
   0x8   :  { %s50_s15 = scalar_lea.vmem %s15_s7, 128  ;;  %p55_p4 = scmp.lt.s32.totalorder %s15_s7, %s15_s7 }
   0x9   :  { %p51_p3 = scmp.ne.s32.totalorder %s15_s7, %s50_s15  ;;  %p56_p5 = scmp.lt.s32.totalorder %s50_s15, %s50_s15 }
   0xb   :  { %p57_p6 = por %p56_p5, %p55_p4 }
   0xd   :  { %p58_p7 = pnand %p57_p6, %p51_p3 }
   0xf   :  { %61 = shalt.err (!%p58_p7)
}
  0x10   :  { %17 = dma.hbm_to_vmem [thread:$0]  %s124_s0, 128, %s15_s7, [#allocation3]  }
  0x11   :  { %84 = dma.done.wait [#allocation3], 128  }
  0x12   :  { %85 = vsyncadd [#allocation3], 4294967168  ;;  %s89_s18 = smov [#allocation5]   ;;  %v21_v0 = vld [vmem:[#allocation2] sm:$0xff] }
  0x13   :  { %s29_s19 = sshll.u32 %s89_s18, 4  ;;  %22 = vst [vmem:[#allocation5] sm:$0xff] %v21_v0  ;;  %s30_s19 = int_to_ptr.vmem [resolvable:$true] %s29_s19 }
  0x14   :  { %s62_s20 = scalar_lea.vmem %s30_s19, 128  ;;  %p67_p9 = scmp.lt.s32.totalorder %s30_s19, %s30_s19 }
  0x15   :  { %p63_p8 = scmp.ne.s32.totalorder %s30_s19, %s62_s20  ;;  %p68_p10 = scmp.lt.s32.totalorder %s62_s20, %s62_s20 }
  0x17   :  { %p69_p11 = por %p68_p10, %p67_p9 }
  0x19   :  { %p70_p12 = pnand %p69_p11, %p63_p8 }
  0x1b   :  { %73 = shalt.err (!%p70_p12)
}
  0x1c   :  { %s74_s23 = scalar_lea.hbm %s125_s1, 128 }
  0x1d   :  { %p75_p13 = scmp.ne.s32.totalorder %s125_s1, %s74_s23  ;;  %p78_p0 = scmp.lt.u32.totalorder %s74_s23, %s125_s1 }
  0x1f   :  { %p80_p1 = pnand %p78_p0, %p75_p13 }
  0x21   :  { %83 = shalt.err (!%p80_p1)
}
  0x22   :  { %32 = dma.vmem_to_hbm [thread:$0]  %s30_s19, 128, %s125_s1, [#allocation4]  }
  0x23   :  { %86 = dma.done.wait [#allocation4], 128  }
  0x24   :  { %87 = vsyncadd [#allocation4], 4294967168 }
  0x25   :  { %36 = vsyncpa [#allocation3], 1 }
  0x26   :  { %37 = vsyncpa [#allocation4], 1 }

// kernel: tpu_custom_call.1
= control target key start
LH: loop header
LB: loop body
LE: loop exit
PB: predicated region body
PF: predicated region fallthrough
CT: control target
= control target key end

     0   :  { %s2841_s0 = inlined_call_operand.hbm [shape: f32[2,32,128], index: 0, kind: input, shape index: {}]   ;;  %s2842_s1 = inlined_call_operand.hbm [shape: f32[2,32,128], index: 1, kind: input, shape index: {}]   ;;  %s2843_s2 = inlined_call_operand.hbm [shape: f32[640,128], index: 2, kind: input, shape index: {}]   ;;  %s2844_s3 = inlined_call_operand.vmem [shape: f32[1,128], index: 3, kind: input, shape index: {}]   ;;  %s2845_s4 = inlined_call_operand.hbm [shape: f32[640,128], index: 4, kind: input, shape index: {}]   ;;  %s2846_s5 = inlined_call_operand.vmem [shape: f32[1,128], index: 5, kind: input, shape index: {}]   ;;  %s2847_s6 = inlined_call_operand.hbm [shape: f32[128,128], index: 6, kind: input, shape index: {}]   ;;  %s2848_s7 = inlined_call_operand.vmem [shape: f32[1,128], index: 7, kind: input, shape index: {}]   ;;  %s2849_s8 = inlined_call_operand.hbm [shape: f32[2,16,128], index: 8, kind: output, shape index: {}]  }
   0x1   :  { %2862 = sst [smem:[#allocation21_spill]] %s2841_s0 }
   0x2   :  { %2863 = sst [smem:[#allocation22_spill]] %s2843_s2 }
   0x3   :  { %2864 = sst [smem:[#allocation23_spill]] %s2845_s4 }
   0x4   :  { %2865 = sst [smem:[#allocation24_spill]] %s2847_s6 }
   0x5   :  { %2866 = sst [smem:[#allocation25_spill]] %s2848_s7 }
   0x6   :  { %2867 = sst [smem:[#allocation26_spill]] %s2849_s8 }
   0x7   :  { %13 = vsyncpa [#allocation3], 0 }
   0x8   :  { %15 = vsyncpa [#allocation3 + $0x1], 0 }
   0x9   :  { %16 = vsyncpa [#allocation6], 0 }
   0xa   :  { %18 = vsyncpa [#allocation6 + $0x1], 0 }
   0xb   :  { %19 = vsyncpa [#allocation9], 0 }
   0xc   :  { %20 = vsyncpa [#allocation4], 0 }
   0xd   :  { %22 = vsyncpa [#allocation4 + $0x1], 0  ;;  %s2412_s27 = smov 0   ;;  %s2414_s28 = smov 0  }
   0xe   :  { %s2416_s29 = smov 0   ;;  %s2418_s30 = smov 0  }
   0xf   :  { %s2420_s9 = smov 0   ;;  %s2422_s10 = smov 0  }
  0x10 LB: > { %2868 = sst [smem:[#allocation17_spill]] %s2332_s27  ;;  %s2443_s11 = sadd.s32 4294967295, %s2352_s10   ;;  %s2352_s10 = sphi %s2422_s10, %s28_s10   ;;  %s2348_s9 = sphi %s2420_s9, %s2899_s9   ;;  %s2344_s30 = sphi %s2418_s30, %s2898_s30   ;;  %s2340_s29 = sphi %s2416_s29, %s2902_s29   ;;  %s2336_s28 = sphi %s2414_s28, %s2901_s28   ;;  %s2332_s27 = sphi %s2412_s27, %s2900_s27  }
  0x11   : > { %2869 = sst [smem:[#allocation18_spill]] %s2348_s9  ;;  %s1436_s12 = sadd.s32 4294967294, %s2352_s10  }
  0x12   : > { %p62_p0 = scmp.ne.s32.totalorder %s2336_s28, %s2332_s27  ;;  %p2850_p1 = scmp.eq.s32.totalorder %s2443_s11, 0 }
  0x13   : > { %p250_p3 = scmp.eq.s32.totalorder %s1436_s12, 1  ;;  %p1437_p5 = scmp.ge.s32.totalorder %s2352_s10, 1 }
  0x14   : > { %p2452_p4 = por %p2850_p1, %p62_p0  ;;  %p257_p7 = scmp.lt.s32.totalorder %s2352_s10, 3 }
  0x15   : > { %p2457_p6 = por %p250_p3, %p62_p0  ;;  %s2354_s16 = smov [#allocation7]  }
  0x16   : > { %s2870_s13 = scalar_select %p2452_p4, 1, 0 }
  0x17   : > { %s2871_s14 = scalar_select %p2457_p6, 1, 0 }
  0x18   : > { %p2462_p8 = pnand %p1437_p5, %p257_p7  ;;  %s269_s17 = sshll.u32 %s2354_s16, 4  ;;  %s2466_s17 = int_to_ptr.vmem [resolvable:$true] %s269_s17 }
  0x19   : > { %2872 = sst [smem:[#allocation19_spill]] %s2871_s14  ;;  %s2355_s19 = smov [#allocation8]  }
  0x1a   : > { %s2873_s15 = scalar_select %p2462_p8, 1, 0 }
  0x1b   : > { %p2026_p9 = pneg %p2462_p8  ;;  %s285_s20 = sshll.u32 %s2355_s19, 4  ;;  %s2477_s20 = int_to_ptr.vmem [resolvable:$true] %s285_s20 }
  0x1c   : > { %s2356_s21 = smov [#allocation10]   ;;  %s2875_s2 = sld [smem:[#allocation22_spill]] }
  0x1d   : > { %p2473_p11 = pnand %p2026_p9, %p2850_p1  ;;  %s2479_s22 = sshll.u32 %s2356_s21, 4  ;;  %s302_s22 = int_to_ptr.vmem [resolvable:$true] %s2479_s22 }
  0x1f   : > { %p2489_p13 = pneg %p2473_p11 }
  0x22   : > { %s2113_s25 = scalar_lea.hbm %s2875_s2, 10240 }
  0x23   : > { %p2114_p12 = scmp.ne.s32.totalorder %s2875_s2, %s2113_s25  ;;  %p2120_p5 = scmp.lt.u32.totalorder %s2113_s25, %s2875_s2 }
  0x25   : > { %p2116_p0 = pnand %p2489_p13, %p2114_p12 }
  0x27   : > { %p2117_p3 = pneg %p2116_p0 }
  0x29   : > { %p2122_p7 = pnand %p2120_p5, %p2117_p3 }
  0x2b   : > { %2125 = shalt.err (!%p2122_p7)
}
  0x2c   : > { %s2126_s23 = scalar_lea.vmem %s2466_s17, 10240  ;;  %p2134_p2 = scmp.lt.s32.totalorder %s2466_s17, %s2466_s17 }
  0x2d   : > { %p2127_p9 = scmp.ne.s32.totalorder %s2466_s17, %s2126_s23  ;;  %p2135_p6 = scmp.lt.s32.totalorder %s2126_s23, %s2126_s23 }
  0x2f   : > { %p2129_p10 = pnand %p2127_p9, %p2489_p13  ;;  %p2136_p12 = por %p2135_p6, %p2134_p2 }
  0x31   : > { %p2130_p1 = pneg %p2129_p10 }
  0x33   : > { %p2137_p0 = pnand %p2136_p12, %p2130_p1 }
  0x35   : > { %2140 = shalt.err (!%p2137_p0)
}
  0x36   : > { %s2856_s24 = smov 128   ;;  %s2858_s25 = smov 8  }
  0x37   : > { %2029 = dma.hbm_to_vmem [thread:$0]  (!%p2473_p11), %s2875_s2, 10240, %s2466_s17, [#allocation6], %s2856_s24, %s2856_s24, %s2858_s25  }
  0x38   : > { %s2877_s4 = sld [smem:[#allocation23_spill]] }
  0x3e   : > { %s2141_s23 = scalar_lea.hbm %s2877_s4, 10240 }
  0x3f   : > { %p2142_p1 = scmp.ne.s32.totalorder %s2877_s4, %s2141_s23  ;;  %p2148_p10 = scmp.lt.u32.totalorder %s2141_s23, %s2877_s4 }
  0x41   : > { %p2144_p2 = pnand %p2142_p1, %p2489_p13 }
  0x43   : > { %p2145_p6 = pneg %p2144_p2 }
  0x45   : > { %p2150_p3 = pnand %p2148_p10, %p2145_p6 }
  0x47   : > { %2153 = shalt.err (!%p2150_p3)
}
  0x48   : > { %s2154_s17 = scalar_lea.vmem %s2477_s20, 10240  ;;  %p2162_p12 = scmp.lt.s32.totalorder %s2477_s20, %s2477_s20 }
  0x49   : > { %p2155_p5 = scmp.ne.s32.totalorder %s2477_s20, %s2154_s17  ;;  %p2163_p0 = scmp.lt.s32.totalorder %s2154_s17, %s2154_s17 }
  0x4b   : > { %p2157_p7 = pnand %p2155_p5, %p2489_p13  ;;  %p2164_p1 = por %p2163_p0, %p2162_p12 }
  0x4d   : > { %p2158_p9 = pneg %p2157_p7 }
  0x4f   : > { %p2165_p2 = pnand %p2164_p1, %p2158_p9 }
  0x51   : > { %2168 = shalt.err (!%p2165_p2)
}
  0x52   : > { %2032 = dma.hbm_to_vmem [thread:$0]  (!%p2473_p11), %s2877_s4, 10240, %s2477_s20, [#allocation9], %s2856_s24, %s2856_s24, %s2858_s25  }
  0x53   : > { %s2878_s6 = sld [smem:[#allocation24_spill]] }
  0x59   : > { %s2169_s26 = scalar_lea.hbm %s2878_s6, 2048 }
  0x5a   : > { %p2170_p6 = scmp.ne.s32.totalorder %s2878_s6, %s2169_s26  ;;  %p2176_p5 = scmp.lt.u32.totalorder %s2169_s26, %s2878_s6 }
  0x5c   : > { %p2172_p10 = pnand %p2170_p6, %p2489_p13 }
  0x5e   : > { %p2173_p3 = pneg %p2172_p10 }
  0x60   : > { %p2178_p7 = pnand %p2176_p5, %p2173_p3 }
  0x62   : > { %2181 = shalt.err (!%p2178_p7)
}
  0x63   : > { %s2182_s17 = scalar_lea.vmem %s302_s22, 2048  ;;  %p2190_p1 = scmp.lt.s32.totalorder %s302_s22, %s302_s22 }
  0x64   : > { %p2183_p9 = scmp.ne.s32.totalorder %s302_s22, %s2182_s17  ;;  %p2191_p2 = scmp.lt.s32.totalorder %s2182_s17, %s2182_s17 }
  0x66   : > { %p2185_p12 = pnand %p2183_p9, %p2489_p13  ;;  %p2192_p4 = por %p2191_p2, %p2190_p1 }
  0x68   : > { %p2186_p0 = pneg %p2185_p12 }
  0x6a   : > { %p2193_p8 = pnand %p2192_p4, %p2186_p0 }
  0x6c   : > { %2196 = shalt.err (!%p2193_p8)
}
  0x6d   : > { %2035 = dma.hbm_to_vmem [thread:$0]  (!%p2473_p11), %s2878_s6, 2048, %s302_s22, [#allocation9], %s2856_s24, %s2856_s24, %s2858_s25  }
  0x6e   : > { %s49_s16 = sadd.s32 1, %s2340_s29  ;;  %s40_s18 = sadd.s32 1, %s2348_s9 }
  0x6f   : > { %p56_p4 = scmp.ne.s32.totalorder %s2340_s29, %s2336_s28  ;;  %p42_p8 = scmp.ge.s32.totalorder %s40_s18, 2 }
  0x70   : > { %p57_p13 = scmp.eq.s32.totalorder %s2352_s10, 0  ;;  %p2879_p6 = scmp.eq.s32.totalorder %s2443_s11, 1 }
  0x71   : > { %p2050_p3 = scmp.lt.s32.totalorder %s2352_s10, 2  ;;  %s2904_s18 = smov (%p42_p8, %s40_s18), 0 }
  0x72   : > { %p2568_p10 = por %p2879_p6, %p56_p4  ;;  %2881 = sst [smem:[#allocation20_spill]] %s2904_s18 }
  0x73   : > { %p58_p5 = por %p57_p13, %p56_p4  ;;  %s318_s27 = sand.u32 1, %s2340_s29  }
  0x74   : > { %s44_s14 = ssub.s32 %s2348_s9, %s2904_s18  ;;  %s2578_s22 = sshll.u32 %s318_s27, 4 }
  0x75   : > { %p47_p7 = scmp.eq.s32.totalorder %s44_s14, 0  ;;  %s1465_s26 = sshll.u32 %s2348_s9, 9 }
  0x76   : > { %s2882_s0 = sld [smem:[#allocation21_spill]]  ;;  %s322_s17 = scalar_lea.vmem [#allocation2], %s2578_s22 }
  0x77   : > { %s2582_s12 = scalar_select %p47_p7, %s2340_s29, %s49_s16  }
  0x78   : > { %s331_s20 = sshll.u32 %s322_s17, 4  ;;  %p2594_p11 = pnand %p2050_p3, %p58_p5  ;;  %s2590_s20 = int_to_ptr.vmem [resolvable:$true] %s331_s20 }
  0x79   : > { %s2601_s19 = scalar_lea.hbm %s2842_s1, %s1465_s26  ;;  %s2606_s24 = scalar_lea.sflag [#allocation3], %s318_s27 }
  0x7a   : > { %s2604_s21 = scalar_lea.hbm %s2601_s19, 256  ;;  %p2199_p12 = pneg %p2594_p11 }
  0x7c   : > { %s2587_s23 = scalar_lea.hbm %s2882_s0, %s1465_s26  ;;  %s2202_s16 = scalar_lea.hbm %s2882_s0, 1024 }
  0x7d   : > { %s2197_s17 = scalar_lea.hbm %s2587_s23, 256  ;;  %p2203_p2 = scmp.lt.u32.totalorder %s2587_s23, %s2882_s0 }
  0x7e   : > { %p2198_p9 = scmp.ne.s32.totalorder %s2587_s23, %s2197_s17  ;;  %p2204_p4 = scmp.lt.u32.totalorder %s2202_s16, %s2197_s17 }
  0x7f   : > { %p2206_p13 = scmp.lt.u32.totalorder %s2197_s17, %s2587_s23 }
  0x80   : > { %p2200_p0 = pnand %p2199_p12, %p2198_p9  ;;  %p2205_p8 = por %p2204_p4, %p2203_p2 }
  0x82   : > { %p2201_p1 = pneg %p2200_p0  ;;  %p2207_p6 = por %p2206_p13, %p2205_p8 }
  0x84   : > { %p2208_p3 = pnand %p2207_p6, %p2201_p1 }
  0x86   : > { %2211 = shalt.err (!%p2208_p3)
}
  0x87   : > { %s2212_s27 = scalar_lea.vmem %s2590_s20, 256  ;;  %s2359_s2 = smov [#allocation2]  }
  0x88   : > { %p2213_p5 = scmp.ne.s32.totalorder %s2590_s20, %s2212_s27  ;;  %s2217_s25 = sshll.u32 %s2359_s2, 4  ;;  %s2218_s25 = int_to_ptr.vmem [resolvable:$false] %s2217_s25 }
  0x89   : > { %s2219_s14 = scalar_lea.vmem %s2218_s25, 512  ;;  %p2220_p0 = scmp.lt.s32.totalorder %s2590_s20, %s2218_s25 }
  0x8a   : > { %p2215_p7 = pnand %p2213_p5, %p2199_p12  ;;  %p2221_p2 = scmp.lt.s32.totalorder %s2219_s14, %s2212_s27 }
  0x8c   : > { %p2216_p9 = pneg %p2215_p7  ;;  %p2222_p4 = por %p2221_p2, %p2220_p0 }
  0x8e   : > { %p2223_p8 = pnand %p2222_p4, %p2216_p9 }
  0x90   : > { %2226 = shalt.err (!%p2223_p8)
}
  0x91   : > { %s2884_s17 = smov 8   ;;  %s2885_s16 = smov 128  }
  0x92   : > { %2039 = dma.hbm_to_vmem [thread:$0]  (!%p2594_p11), %s2587_s23, 256, %s2590_s20, %s2606_s24, %s2885_s16, %s2885_s16, %s2884_s17  }
  0x93   : > { %s345_s26 = scalar_lea.vmem [#allocation5], %s2578_s22  ;;  %s341_s2 = sand.u32 1, %s2352_s10  }
  0x94   : > { %s355_s27 = sshll.u32 %s345_s26, 4  ;;  %s2641_s25 = scalar_lea.sflag [#allocation6], %s341_s2  ;;  %s2639_s27 = int_to_ptr.vmem [resolvable:$true] %s355_s27 }
  0x95   : > { %s2257_s14 = scalar_lea.hbm %s2601_s19, 512  ;;  %s2232_s6 = scalar_lea.hbm %s2842_s1, 1024 }
  0x96   : > { %p2228_p1 = scmp.ne.s32.totalorder %s2604_s21, %s2257_s14  ;;  %p2233_p3 = scmp.lt.u32.totalorder %s2604_s21, %s2842_s1 }
  0x97   : > { %p2234_p5 = scmp.lt.u32.totalorder %s2232_s6, %s2257_s14  ;;  %p2236_p9 = scmp.lt.u32.totalorder %s2257_s14, %s2604_s21 }
  0x98   : > { %p2230_p13 = pnand %p2228_p1, %p2199_p12 }
  0x99   : > { %p2235_p7 = por %p2234_p5, %p2233_p3 }
  0x9a   : > { %p2231_p6 = pneg %p2230_p13 }
  0x9b   : > { %p2237_p0 = por %p2236_p9, %p2235_p7 }
  0x9d   : > { %p2238_p2 = pnand %p2237_p0, %p2231_p6 }
  0x9f   : > { %2241 = shalt.err (!%p2238_p2)
}
  0xa0   : > { %s2242_s24 = scalar_lea.vmem %s2639_s27, 256  ;;  %s2360_s0 = smov [#allocation5]  }
  0xa1   : > { %p2243_p4 = scmp.ne.s32.totalorder %s2639_s27, %s2242_s24  ;;  %s2247_s4 = sshll.u32 %s2360_s0, 4  ;;  %s2248_s4 = int_to_ptr.vmem [resolvable:$false] %s2247_s4 }
  0xa2   : > { %s2249_s9 = scalar_lea.vmem %s2248_s4, 512  ;;  %p2250_p13 = scmp.lt.s32.totalorder %s2639_s27, %s2248_s4 }
  0xa3   : > { %p2245_p8 = pnand %p2243_p4, %p2199_p12  ;;  %p2251_p3 = scmp.lt.s32.totalorder %s2249_s9, %s2242_s24 }
  0xa5   : > { %p2246_p1 = pneg %p2245_p8  ;;  %p2252_p5 = por %p2251_p3, %p2250_p13 }
  0xa7   : > { %p2253_p7 = pnand %p2252_p5, %p2246_p1 }
  0xa9   : > { %2256 = shalt.err (!%p2253_p7)
}
  0xaa   : > { %2042 = dma.hbm_to_vmem [thread:$0]  (!%p2594_p11), %s2604_s21, 256, %s2639_s27, %s2641_s25, %s2885_s16, %s2885_s16, %s2884_s17  }
  0xab   : > { %p2886_p12 = scmp.ne.s32.totalorder %s2873_s15, 0 }
  0xac   : > { %s2673_s6 = sand.u32 (!%p2886_p12), 1, %s2336_s28   ;;  %p2887_p6 = scmp.ne.s32.totalorder (!%p2886_p12), %s2870_s13, 0 }
  0xad   : > { %367 = sbr.rel (%p2886_p12) target bundleno = 750 (0x2ee), region = 52  ;;  %s2676_s18 = sshll.u32 (!%p2886_p12), %s2673_s6, 4 }
  0xae   : > { %s370_s22 = scalar_lea.sflag (!%p2886_p12), [#allocation3], %s2673_s6  ;;  %s373_s23 = scalar_lea.vmem (!%p2886_p12), [#allocation2], %s2676_s18 }
  0xb4   : > { %2311 = dma.done.wait (%p2887_p6), %s370_s22, 256  }
  0xb5   : > { %2313 = vsyncadd (%p2887_p6), %s370_s22, 4294967040  ;;  %s378_s15 = sand.u32 1, %s2443_s11   ;;  %s382_s7 = scalar_lea.vmem [#allocation5], %s2676_s18 }
  0xb6   : > { %s379_s20 = scalar_lea.sflag [#allocation6], %s378_s15 }
  0xb7   : > { %2315 = dma.done.wait (%p2887_p6), %s379_s20, 256  }
  0xb8   : > { %2317 = vsyncadd (%p2887_p6), %s379_s20, 4294967040  ;;  %p2888_p11 = scmp.eq.s32.totalorder %s2443_s11, 0 }
  0xba   : > { %2319 = dma.done.wait (%p2888_p11), [#allocation6], 10240   ;;  %p2889_p9 = pmov %p2888_p11 }
  0xbc   : > { %2321 = vsyncadd (%p2889_p9), [#allocation6], 4294957056  ;;  %p2890_p0 = pmov %p2889_p9 }
  0xbe   : > { %2323 = dma.done.wait (%p2890_p0), [#allocation9], 12288   ;;  %p2891_p2 = pmov %p2890_p0 }
  0xbf   : > { %v493_v0 = vld [vmem:[#allocation7 + $0x80] sm:$0xff]  ;;  %v494_v1 = vld [vmem:[#allocation7 + $0x88] sm:$0xff]  ;;  %v495_v11 = vld [vmem:[#allocation7 + $0x90] sm:$0xff]  ;;  %vm444_vm0 = vcmask 1045504   ;;  %vm466_vm1 = vcmask 1041408   ;;  %vm455_vm2 = vcmask 1043456  }
  0xc0   : > { %2325 = vsyncadd (%p2891_p2), [#allocation9], 4294955008  ;;  %v477_v2 = vld [vmem:[#allocation7] sm:$0xff]  ;;  %v1792_v3 = vpack.c.bf16 %v494_v1, %v493_v0  ;;  %v478_v4 = vld [vmem:[#allocation7 + $0x8] sm:$0xff]  ;;  %vm2362_vm3 = vmmov 0   ;;  %s2892_s26 = sld [smem:[#allocation25_spill]] }
  0xc1   : > { %v525_v5 = vld [vmem:[#allocation7 + $0x180] sm:$0xff]  ;;  %v526_v6 = vld [vmem:[#allocation7 + $0x188] sm:$0xff]  ;;  %v1794_v7 = vpack.c.bf16 %v478_v4, %v477_v2  ;;  %v496_v13 = vld [vmem:[#allocation7 + $0x98] sm:$0xff]  ;;  %s431_s27 = scalar_lea.vmem [#allocation11], %s2676_s18  ;;  %s1467_s25 = sshll.u32 %s2344_s30, 8 }
  0xc2   : > { %v1824_v8 = vpack.c.bf16 %v526_v6, %v525_v5  ;;  %v509_v9 = vld [vmem:[#allocation7 + $0x100] sm:$0xff]  ;;  %v510_v10 = vld [vmem:[#allocation7 + $0x108] sm:$0xff]  ;;  %1793 = vmatprep.subr.bf16.mxu0 %v1792_v3  ;;  %v479_v14 = vld [vmem:[#allocation7 + $0x10] sm:$0xff]  ;;  %v1796_v16 = vpack.c.bf16 %v496_v13, %v495_v11  ;;  %s1293_s2 = sshll.u32 %s431_s27, 4  ;;  %s2893_s0 = sld [smem:[#allocation26_spill]]  ;;  %s2787_s2 = int_to_ptr.vmem [resolvable:$true] %s1293_s2 }
  0xc3   : > { %v1826_v12 = vpack.c.bf16 %v510_v10, %v509_v9  ;;  %v480_v15 = vld [vmem:[#allocation7 + $0x18] sm:$0xff]  ;;  %1795 = vmatpush3.bf16.msra.mxu0 %v1794_v7  ;;  %v527_v18 = vld [vmem:[#allocation7 + $0x190] sm:$0xff]  ;;  %v497_v23 = vld [vmem:[#allocation7 + $0xa0] sm:$0xff]  ;;  %s1278_s9 = scalar_lea.sflag [#allocation4], %s2673_s6  ;;  %s2258_s18 = scalar_lea.vmem %s2787_s2, 256 }
  0xc4   : > { %1825 = vmatprep.subr.bf16.mxu1 %v1824_v8  ;;  %v1798_v17 = vpack.c.bf16 %v480_v15, %v479_v14  ;;  %v528_v19 = vld [vmem:[#allocation7 + $0x198] sm:$0xff]  ;;  %v511_v20 = vld [vmem:[#allocation7 + $0x110] sm:$0xff]  ;;  %v498_v24 = vld [vmem:[#allocation7 + $0xa8] sm:$0xff]  ;;  %1797 = vmatprep.subr.bf16.mxu0 %v1796_v16  ;;  %p2259_p4 = scmp.ne.s32.totalorder %s2787_s2, %s2258_s18  ;;  %s2364_s30 = smov [#allocation11]  }
  0xc5   : > { %1827 = vmatpush3.bf16.msra.mxu1 %v1826_v12  ;;  %v1828_v21 = vpack.c.bf16 %v528_v19, %v527_v18  ;;  %v512_v22 = vld [vmem:[#allocation7 + $0x118] sm:$0xff]  ;;  %v1800_v26 = vpack.c.bf16 %v498_v24, %v497_v23  ;;  %v481_v27 = vld [vmem:[#allocation7 + $0x20] sm:$0xff]  ;;  %v482_v28 = vld [vmem:[#allocation7 + $0x28] sm:$0xff]  ;;  %s2262_s22 = sshll.u32 %s2364_s30, 4  ;;  %s2263_s22 = int_to_ptr.vmem [resolvable:$false] %s2262_s22 }
  0xc6   : > { %v1830_v25 = vpack.c.bf16 %v512_v22, %v511_v20  ;;  %v529_v29 = vld [vmem:[#allocation7 + $0x1a0] sm:$0xff]  ;;  %v530_v30 = vld [vmem:[#allocation7 + $0x1a8] sm:$0xff]  ;;  %v1802_v33 = vpack.c.bf16 %v482_v28, %v481_v27  ;;  %v499_v35 = vld [vmem:[#allocation7 + $0xb0] sm:$0xff]  ;;  %p2260_p8 = pnand %p2259_p4, %p2568_p10  ;;  %p2265_p13 = scmp.lt.s32.totalorder %s2787_s2, %s2263_s22 }
  0xc7   : > { %1829 = vmatprep.subr.bf16.mxu1 %v1828_v21  ;;  %v513_v31 = vld [vmem:[#allocation7 + $0x120] sm:$0xff]  ;;  %v514_v32 = vld [vmem:[#allocation7 + $0x128] sm:$0xff]  ;;  %1799 = vmatpush3.bf16.msra.mxu0 %v1798_v17  ;;  %v1832_v34 = vpack.c.bf16 %v530_v30, %v529_v29  ;;  %v500_v36 = vld [vmem:[#allocation7 + $0xb8] sm:$0xff] }
  0xc8   : > { %v483_v37 = vld [vmem:[#allocation7 + $0x30] sm:$0xff]  ;;  %1801 = vmatprep.subr.bf16.mxu0 %v1800_v26  ;;  %v1834_v38 = vpack.c.bf16 %v514_v32, %v513_v31  ;;  %v1804_v39 = vpack.c.bf16 %v500_v36, %v499_v35  ;;  %v484_v40 = vld [vmem:[#allocation7 + $0x38] sm:$0xff]  ;;  %v501_v46 = vld [vmem:[#allocation7 + $0xc0] sm:$0xff]  ;;  %s2792_s4 = scalar_lea.hbm %s2893_s0, %s1467_s25  ;;  %p2261_p1 = pneg %p2260_p8 }
  0xc9   : > { %1831 = vmatpush3.bf16.msra.mxu1 %v1830_v25  ;;  %v531_v41 = vld [vmem:[#allocation7 + $0x1b0] sm:$0xff]  ;;  %v532_v42 = vld [vmem:[#allocation7 + $0x1b8] sm:$0xff]  ;;  %v502_v47 = vld [vmem:[#allocation7 + $0xc8] sm:$0xff]  ;;  %v1806_v48 = vpack.c.bf16 %v484_v40, %v483_v37 }
  0xca   : > { %1833 = vmatprep.subr.bf16.mxu1 %v1832_v34  ;;  %v1836_v43 = vpack.c.bf16 %v532_v42, %v531_v41  ;;  %v515_v44 = vld [vmem:[#allocation7 + $0x130] sm:$0xff]  ;;  %v516_v45 = vld [vmem:[#allocation7 + $0x138] sm:$0xff]  ;;  %v533_v49 = vld [vmem:[#allocation7 + $0x1c0] sm:$0xff]  ;;  %v1808_v52 = vpack.c.bf16 %v502_v47, %v501_v46 }
  0xcb   : > { %1803 = vmatpush3.bf16.msra.mxu0 %v1802_v33  ;;  %v534_v50 = vld [vmem:[#allocation7 + $0x1c8] sm:$0xff]  ;;  %v1838_v51 = vpack.c.bf16 %v516_v45, %v515_v44  ;;  %v485_v53 = vld [vmem:[#allocation7 + $0x40] sm:$0xff]  ;;  %v503_v58 = vld [vmem:[#allocation7 + $0xd0] sm:$0xff] }
  0xcc   : > { %1805 = vmatprep.subr.bf16.mxu0 %v1804_v39  ;;  %v486_v54 = vld [vmem:[#allocation7 + $0x48] sm:$0xff]  ;;  %v517_v55 = vld [vmem:[#allocation7 + $0x140] sm:$0xff]  ;;  %v1840_v56 = vpack.c.bf16 %v534_v50, %v533_v49  ;;  %v504_v59 = vld [vmem:[#allocation7 + $0xd8] sm:$0xff]  ;;  %v2361_v49 = vmov 0.0|0.0  }
  0xcd   : > { %1835 = vmatpush3.bf16.msra.mxu1 %v1834_v38  ;;  %v518_v57 = vld [vmem:[#allocation7 + $0x148] sm:$0xff]  ;;  %v535_v60 = vld [vmem:[#allocation7 + $0x1d0] sm:$0xff]  ;;  %v536_v61 = vld [vmem:[#allocation7 + $0x1d8] sm:$0xff]  ;;  %v1810_v62 = vpack.c.bf16 %v486_v54, %v485_v53  ;;  %v1812_v0 = vpack.c.bf16 %v504_v59, %v503_v58 }
  0xce   : > { %1837 = vmatprep.subr.bf16.mxu1 %v1836_v43  ;;  %v1842_v63 = vpack.c.bf16 %v518_v57, %v517_v55  ;;  %v487_v1 = vld [vmem:[#allocation7 + $0x50] sm:$0xff]  ;;  %v488_v2 = vld [vmem:[#allocation7 + $0x58] sm:$0xff]  ;;  %v1844_v4 = vpack.c.bf16 %v536_v61, %v535_v60  ;;  %v505_v6 = vld [vmem:[#allocation7 + $0xe0] sm:$0xff] }
  0xcf   : > { %1807 = vmatpush3.bf16.msra.mxu0 %v1806_v48  ;;  %v519_v3 = vld [vmem:[#allocation7 + $0x150] sm:$0xff]  ;;  %v520_v5 = vld [vmem:[#allocation7 + $0x158] sm:$0xff]  ;;  %v506_v7 = vld [vmem:[#allocation7 + $0xe8] sm:$0xff]  ;;  %v1814_v10 = vpack.c.bf16 %v488_v2, %v487_v1 }
  0xd0   : > { %1809 = vmatprep.subr.bf16.mxu0 %v1808_v52  ;;  %v537_v8 = vld [vmem:[#allocation7 + $0x1e0] sm:$0xff]  ;;  %v538_v9 = vld [vmem:[#allocation7 + $0x1e8] sm:$0xff]  ;;  %v1846_v13 = vpack.c.bf16 %v520_v5, %v519_v3  ;;  %v1816_v14 = vpack.c.bf16 %v506_v7, %v505_v6  ;;  %v507_v22 = vld [vmem:[#allocation7 + $0xf0] sm:$0xff] }
  0xd1   : > { %1839 = vmatpush3.bf16.msra.mxu1 %v1838_v51  ;;  %v489_v11 = vld [vmem:[#allocation7 + $0x60] sm:$0xff]  ;;  %v490_v15 = vld [vmem:[#allocation7 + $0x68] sm:$0xff]  ;;  %v1848_v20 = vpack.c.bf16 %v538_v9, %v537_v8  ;;  %v508_v23 = vld [vmem:[#allocation7 + $0xf8] sm:$0xff]  ;;  %v2363_v8 = vmov 0.0  }
  0xd2   : > { %1841 = vmatprep.subr.bf16.mxu1 %v1840_v56  ;;  %v2700_v12 = vld [vmem:[%s373_s23] sm:$0xff]  ;;  %v2704_v17 = vld [vmem:[%s373_s23 + $0x8] sm:$0xff]  ;;  %v1818_v28 = vpack.c.bf16 %v490_v15, %v489_v11  ;;  %v1820_v32 = vpack.c.bf16 %v508_v23, %v507_v22  ;;  %s2264_s23 = scalar_lea.vmem %s2263_s22, 512 }
  0xd3   : > { %1811 = vmatpush3.bf16.msra.mxu0 %v1810_v62  ;;  %v521_v16 = vld [vmem:[#allocation7 + $0x160] sm:$0xff]  ;;  %v445_v18 = vrot.slane %v2700_v12, 2  ;;  %v467_v19 = vrot.slane %v2700_v12, 6  ;;  %v522_v21 = vld [vmem:[#allocation7 + $0x168] sm:$0xff]  ;;  %v446_v24 = vrot.slane %v2704_v17, 2  ;;  %v468_v25 = vrot.slane %v2704_v17, 6  ;;  %p2266_p3 = scmp.lt.s32.totalorder %s2264_s23, %s2258_s18 }
  0xd4   : > { %1813 = vmatprep.subr.bf16.mxu0 %v1812_v0  ;;  %v539_v26 = vld [vmem:[#allocation7 + $0x1f0] sm:$0xff]  ;;  %v540_v27 = vld [vmem:[#allocation7 + $0x1f8] sm:$0xff]  ;;  %v1850_v31 = vpack.c.bf16 %v522_v21, %v521_v16  ;;  %v541_v41 = vld [vmem:[#allocation7 + $0x200] sm:$0xff]  ;;  %v456_v43 = vrot.slane %v2700_v12, 4  ;;  %v457_v44 = vrot.slane %v2704_v17, 4 }
  0xd5   : > { %1843 = vmatpush3.bf16.msra.mxu1 %v1842_v63  ;;  %v447_v29 = vsel %vm444_vm0, %v445_v18, %v446_v24  ;;  %v469_v30 = vsel %vm466_vm1, %v467_v19, %v468_v25  ;;  %v491_v33 = vld [vmem:[#allocation7 + $0x70] sm:$0xff]  ;;  %v492_v34 = vld [vmem:[#allocation7 + $0x78] sm:$0xff]  ;;  %v1852_v35 = vpack.c.bf16 %v540_v27, %v539_v26  ;;  %v542_v42 = vld [vmem:[#allocation7 + $0x208] sm:$0xff]  ;;  %p2267_p5 = por %p2266_p3, %p2265_p13 }
  0xd6   : > { %1845 = vmatprep.subr.bf16.mxu1 %v1844_v4  ;;  %628 = vmatprep.mubr.f32.mxu0 %v447_v29  ;;  %v523_v36 = vld [vmem:[#allocation7 + $0x170] sm:$0xff]  ;;  %v524_v37 = vld [vmem:[#allocation7 + $0x178] sm:$0xff]  ;;  %v1822_v39 = vpack.c.bf16 %v492_v34, %v491_v33  ;;  %v1857_v48 = vpack.c.bf16 %v542_v42, %v541_v41  ;;  %v458_v50 = vsel %vm455_vm2, %v456_v43, %v457_v44  ;;  %v545_v59 = vld [vmem:[#allocation7 + $0x220] sm:$0xff] }
  0xd7   : > { %1815 = vmatpush3.bf16.msra.mxu0 %v1814_v10  ;;  %708 = vmatprep.mubr.f32.mxu1 %v469_v30  ;;  %v2714_v38 = vld [vmem:[%s382_s7] sm:$0xff]  ;;  %v1854_v40 = vpack.c.bf16 %v524_v37, %v523_v36  ;;  %v2722_v47 = vld [vmem:[%s382_s7 + $0x8] sm:$0xff]  ;;  %p2268_p7 = pnand %p2267_p5, %p2261_p1 }
  0xd8   : > { %1817 = vmatprep.subr.bf16.mxu0 %v1816_v14  ;;  %v448_v45 = vrot.slane %v2714_v38, 2  ;;  %v470_v46 = vrot.slane %v2714_v38, 6  ;;  %v543_v51 = vld [vmem:[#allocation7 + $0x210] sm:$0xff]  ;;  %v544_v52 = vld [vmem:[#allocation7 + $0x218] sm:$0xff]  ;;  %v459_v53 = vrot.slane %v2714_v38, 4  ;;  %v450_v55 = vrot.slane %v2722_v47, 2 }
  0xd9   : > { %1847 = vmatpush3.bf16.msra.mxu1 %v1846_v13  ;;  %v472_v57 = vrot.slane %v2722_v47, 6  ;;  %v1860_v58 = vpack.c.bf16 %v544_v52, %v543_v51  ;;  %v546_v60 = vld [vmem:[#allocation7 + $0x228] sm:$0xff]  ;;  %v461_v62 = vrot.slane %v2722_v47, 4  ;;  %v547_v2 = vld [vmem:[#allocation7 + $0x230] sm:$0xff]  ;;  %v548_v3 = vld [vmem:[#allocation7 + $0x238] sm:$0xff] }
  0xda   : > { %1849 = vmatprep.subr.bf16.mxu1 %v1848_v20  ;;  %v449_v54 = vsel %vm444_vm0, %v446_v24, %v448_v45  ;;  %v471_v56 = vsel %vm466_vm1, %v468_v25, %v470_v46  ;;  %v460_v61 = vsel %vm455_vm2, %v457_v44, %v459_v53  ;;  %v451_v63 = vsel %vm444_vm0, %v448_v45, %v450_v55  ;;  %v549_v6 = vld [vmem:[#allocation7 + $0x240] sm:$0xff]  ;;  %v550_v7 = vld [vmem:[#allocation7 + $0x248] sm:$0xff]  ;;  %v551_v10 = vld [vmem:[#allocation7 + $0x250] sm:$0xff] }
  0xdb   : > { %1819 = vmatpush3.bf16.msra.mxu0 %v1818_v28  ;;  %v473_v0 = vsel %vm466_vm1, %v470_v46, %v472_v57  ;;  %v1863_v1 = vpack.c.bf16 %v546_v60, %v545_v59  ;;  %v462_v4 = vsel %vm455_vm2, %v459_v53, %v461_v62  ;;  %v1866_v5 = vpack.c.bf16 %v548_v3, %v547_v2  ;;  %v552_v11 = vld [vmem:[#allocation7 + $0x258] sm:$0xff]  ;;  %v553_v13 = vld [vmem:[#allocation7 + $0x260] sm:$0xff]  ;;  %v554_v14 = vld [vmem:[#allocation7 + $0x268] sm:$0xff] }
  0xdc   : > { %1821 = vmatprep.subr.bf16.mxu0 %v1820_v32  ;;  %v1869_v9 = vpack.c.bf16 %v550_v7, %v549_v6  ;;  %v1875_v15 = vpack.c.bf16 %v554_v14, %v553_v13  ;;  %v555_v16 = vld [vmem:[#allocation7 + $0x270] sm:$0xff]  ;;  %v556_v18 = vld [vmem:[#allocation7 + $0x278] sm:$0xff]  ;;  %v875_v20 = vld [vmem:[#allocation8 + $0x80] sm:$0xff] }
  0xdd   : > { %1851 = vmatpush3.bf16.msra.mxu1 %v1850_v31  ;;  %v1878_v19 = vpack.c.bf16 %v556_v18, %v555_v16  ;;  %v876_v21 = vld [vmem:[#allocation8 + $0x88] sm:$0xff]  ;;  %v859_v22 = vld [vmem:[#allocation8] sm:$0xff]  ;;  %v877_v31 = vld [vmem:[#allocation8 + $0x90] sm:$0xff] }
  0xde   : > { %1853 = vmatprep.subr.bf16.mxu1 %v1852_v35  ;;  %v1880_v23 = vpack.c.bf16 %v876_v21, %v875_v20  ;;  %v860_v24 = vld [vmem:[#allocation8 + $0x8] sm:$0xff]  ;;  %v907_v25 = vld [vmem:[#allocation8 + $0x180] sm:$0xff]  ;;  %v878_v33 = vld [vmem:[#allocation8 + $0x98] sm:$0xff] }
  0xdf   : > { %1823 = vmatpush3.bf16.msra.mxu0 %v1822_v39  ;;  %v908_v26 = vld [vmem:[#allocation8 + $0x188] sm:$0xff]  ;;  %v1882_v27 = vpack.c.bf16 %v860_v24, %v859_v22  ;;  %v891_v29 = vld [vmem:[#allocation8 + $0x100] sm:$0xff]  ;;  %v861_v34 = vld [vmem:[#allocation8 + $0x10] sm:$0xff]  ;;  %v1884_v36 = vpack.c.bf16 %v878_v33, %v877_v31 }
  0xe0   : > { %1856 = vmatprep.subr.bf16.mxu0 %v2361_v49  ;;  %v1912_v28 = vpack.c.bf16 %v908_v26, %v907_v25  ;;  %v892_v30 = vld [vmem:[#allocation8 + $0x108] sm:$0xff]  ;;  %v862_v35 = vld [vmem:[#allocation8 + $0x18] sm:$0xff]  ;;  %v909_v39 = vld [vmem:[#allocation8 + $0x190] sm:$0xff] }
  0xe1   : > { %1855 = vmatpush3.bf16.msra.mxu1 %v1854_v40  ;;  %v1914_v32 = vpack.c.bf16 %v892_v30, %v891_v29  ;;  %v1886_v37 = vpack.c.bf16 %v862_v35, %v861_v34  ;;  %v910_v40 = vld [vmem:[#allocation8 + $0x198] sm:$0xff]  ;;  %v893_v41 = vld [vmem:[#allocation8 + $0x110] sm:$0xff]  ;;  %v879_v44 = vld [vmem:[#allocation8 + $0xa0] sm:$0xff] }
  0xe2   : > { %629 = vmatmul.mubr.f32.vlgmr.msra.gmra.mrb[0].mxu0 %v2700_v12  ;;  %v1872_v12 = vpack.c.bf16 %v552_v11, %v551_v10  ;;  %1881 = vmatprep.subr.bf16.mxu1 %v1880_v23  ;;  %v1916_v42 = vpack.c.bf16 %v910_v40, %v909_v39  ;;  %v894_v43 = vld [vmem:[#allocation8 + $0x118] sm:$0xff]  ;;  %v880_v45 = vld [vmem:[#allocation8 + $0xa8] sm:$0xff]  ;;  %v895_v52 = vld [vmem:[#allocation8 + $0x120] sm:$0xff] }
  0xe3   : > { %1858 = vmatpush3.bf16.msra.mxu0 %v1857_v48  ;;  %633 = vmatprep.mubr.f32.mxu0 %v449_v54  ;;  %v1918_v46 = vpack.c.bf16 %v894_v43, %v893_v41  ;;  %v863_v48 = vld [vmem:[#allocation8 + $0x20] sm:$0xff]  ;;  %v912_v51 = vld [vmem:[#allocation8 + $0x1a8] sm:$0xff]  ;;  %v882_v57 = vld [vmem:[#allocation8 + $0xb8] sm:$0xff] }
  0xe4   : > { %709 = vmatmul.mubr.f32.vlgmr.msra.gmra.mrb[0].mxu1 %v458_v50  ;;  %1859 = vmatprep.subr.bf16.mxu0 %v2361_v49  ;;  %v911_v50 = vld [vmem:[#allocation8 + $0x1a0] sm:$0xff]  ;;  %v896_v53 = vld [vmem:[#allocation8 + $0x128] sm:$0xff]  ;;  %v913_v62 = vld [vmem:[#allocation8 + $0x1b0] sm:$0xff] }
  0xe5   : > { %713 = vmatprep.mubr.f32.mxu1 %v471_v56  ;;  %1883 = vmatpush3.bf16.msra.mxu1 %v1882_v27  ;;  %v1920_v55 = vpack.c.bf16 %v912_v51, %v911_v50  ;;  %v881_v56 = vld [vmem:[#allocation8 + $0xb0] sm:$0xff]  ;;  %v1922_v59 = vpack.c.bf16 %v896_v53, %v895_v52  ;;  %v898_v2 = vld [vmem:[#allocation8 + $0x138] sm:$0xff]  ;;  %v883_v3 = vld [vmem:[#allocation8 + $0xc0] sm:$0xff] }
  0xe6   : > { %634 = vmatmul.mubr.f32.gmra.mrb[2].mxu0 %v2704_v17  ;;  %1885 = vmatprep.subr.bf16.mxu1 %v1884_v36  ;;  %v1892_v60 = vpack.c.bf16 %v882_v57, %v881_v56  ;;  %v915_v6 = vld [vmem:[#allocation8 + $0x1c0] sm:$0xff]  ;;  %v916_v7 = vld [vmem:[#allocation8 + $0x1c8] sm:$0xff]  ;;  %v885_v18 = vld [vmem:[#allocation8 + $0xd0] sm:$0xff] }
  0xe7   : > { %1861 = vmatpush3.bf16.msra.mxu0 %v1860_v58  ;;  %638 = vmatprep.mubr.f32.mxu0 %v451_v63  ;;  %v865_v58 = vld [vmem:[#allocation8 + $0x30] sm:$0xff]  ;;  %v914_v63 = vld [vmem:[#allocation8 + $0x1b8] sm:$0xff]  ;;  %v867_v10 = vld [vmem:[#allocation8 + $0x40] sm:$0xff] }
  0xe8   : > { %714 = vmatmul.mubr.f32.gmra.mrb[2].mxu1 %v460_v61  ;;  %1862 = vmatprep.subr.bf16.mxu0 %v2361_v49  ;;  %v866_v61 = vld [vmem:[#allocation8 + $0x38] sm:$0xff]  ;;  %v868_v11 = vld [vmem:[#allocation8 + $0x48] sm:$0xff]  ;;  %v899_v13 = vld [vmem:[#allocation8 + $0x140] sm:$0xff] }
  0xe9   : > { %718 = vmatprep.mubr.f32.mxu1 %v473_v0  ;;  %1887 = vmatpush3.bf16.msra.mxu1 %v1886_v37  ;;  %v1924_v0 = vpack.c.bf16 %v914_v63, %v913_v62  ;;  %v900_v14 = vld [vmem:[#allocation8 + $0x148] sm:$0xff]  ;;  %v869_v21 = vld [vmem:[#allocation8 + $0x50] sm:$0xff]  ;;  %v870_v22 = vld [vmem:[#allocation8 + $0x58] sm:$0xff] }
  0xea   : > { %639 = vmatmul.mubr.f32.gmra.mrb[4].mxu0 %v2714_v38  ;;  %v1930_v16 = vpack.c.bf16 %v900_v14, %v899_v13  ;;  %v917_v23 = vld [vmem:[#allocation8 + $0x1d0] sm:$0xff]  ;;  %v1902_v24 = vpack.c.bf16 %v870_v22, %v869_v21  ;;  %v918_v25 = vld [vmem:[#allocation8 + $0x1d8] sm:$0xff]  ;;  %v887_v30 = vld [vmem:[#allocation8 + $0xe0] sm:$0xff] }
  0xeb   : > { %1864 = vmatpush3.bf16.msra.mxu0 %v1863_v1  ;;  %1713 = vmatprep.mubr.msk.f32.mxu0 %vm2362_vm3, %v2363_v8  ;;  %v897_v1 = vld [vmem:[#allocation8 + $0x130] sm:$0xff]  ;;  %v902_v27 = vld [vmem:[#allocation8 + $0x158] sm:$0xff]  ;;  %v888_v31 = vld [vmem:[#allocation8 + $0xe8] sm:$0xff] }
  0xec   : > { %719 = vmatmul.mubr.f32.gmra.mrb[4].mxu1 %v462_v4  ;;  %1865 = vmatprep.subr.bf16.mxu0 %v2361_v49  ;;  %v884_v4 = vld [vmem:[#allocation8 + $0xc8] sm:$0xff]  ;;  %v901_v26 = vld [vmem:[#allocation8 + $0x150] sm:$0xff]  ;;  %v871_v33 = vld [vmem:[#allocation8 + $0x60] sm:$0xff] }
  0xed   : > { %v1934_v29 = vpack.c.bf16 %v902_v27, %v901_v26  ;;  %v872_v34 = vld [vmem:[#allocation8 + $0x68] sm:$0xff]  ;;  %v919_v35 = vld [vmem:[#allocation8 + $0x1e0] sm:$0xff]  ;;  %v889_v43 = vld [vmem:[#allocation8 + $0xf0] sm:$0xff] }
  0xee   : > { %v1906_v36 = vpack.c.bf16 %v872_v34, %v871_v33  ;;  %v920_v37 = vld [vmem:[#allocation8 + $0x1e8] sm:$0xff]  ;;  %v903_v39 = vld [vmem:[#allocation8 + $0x160] sm:$0xff]  ;;  %v922_v50 = vld [vmem:[#allocation8 + $0x1f8] sm:$0xff] }
  0xef   : > { %1867 = vmatpush3.bf16.msra.mxu0 %v1866_v5  ;;  %v1894_v5 = vpack.c.bf16 %v866_v61, %v865_v58  ;;  %v904_v40 = vld [vmem:[#allocation8 + $0x168] sm:$0xff]  ;;  %v1936_v41 = vpack.c.bf16 %v920_v37, %v919_v35  ;;  %v905_v51 = vld [vmem:[#allocation8 + $0x170] sm:$0xff]  ;;  %v906_v52 = vld [vmem:[#allocation8 + $0x178] sm:$0xff] }
  0xf0   : > { %1868 = vmatprep.subr.bf16.mxu0 %v2361_v49  ;;  %v924_v56 = vld [vmem:[#allocation8 + $0x208] sm:$0xff]  ;;  %v1173_v58 = vld [vmem:[#allocation10] sm:$0xff] }
  0xf1   : > { %v1455_v62 = vld [vmem:[%s2844_s3] ss:$0 sm:$0xff] }
  0xf3   : > { %1870 = vmatpush3.bf16.msra.mxu0 %v1869_v9  ;;  %v1896_v9 = vpack.c.bf16 %v884_v4, %v883_v3 }
  0xf4   : > { %1871 = vmatprep.subr.bf16.mxu0 %v2361_v49 }
  0xf7   : > { %1873 = vmatpush3.bf16.msra.mxu0 %v1872_v12  ;;  %v1928_v12 = vpack.c.bf16 %v916_v7, %v915_v6 }
  0xf8   : > { %1874 = vmatprep.subr.bf16.mxu0 %v2361_v49 }
  0xfb   : > { %1876 = vmatpush3.bf16.msra.mxu0 %v1875_v15  ;;  %v1898_v15 = vpack.c.bf16 %v868_v11, %v867_v10 }
  0xfc   : > { %1877 = vmatprep.subr.bf16.mxu0 %v2361_v49  ;;  %v864_v49 = vld [vmem:[#allocation8 + $0x28] sm:$0xff] }
  0xfd   : > { %v1890_v54 = vpack.c.bf16 %v864_v49, %v863_v48  ;;  %v921_v48 = vld [vmem:[#allocation8 + $0x1f0] sm:$0xff] }
  0xfe   : > { %v1940_v53 = vpack.c.bf16 %v922_v50, %v921_v48 }
  0xff   : > { %1879 = vmatpush3.bf16.msra.mxu0 %v1878_v19  ;;  %v886_v19 = vld [vmem:[#allocation8 + $0xd8] sm:$0xff] }
 0x100   : > { %1913 = vmatprep.subr.bf16.mxu0 %v1912_v28  ;;  %v1900_v20 = vpack.c.bf16 %v886_v19, %v885_v18  ;;  %v1932_v28 = vpack.c.bf16 %v918_v25, %v917_v23  ;;  %v807_v23 = vlaneseq }
 0x102   : > { %1714 = vmatmul.mubr.f32.vlgmr.msra.gmra.mrb[6].mxu0 %v2704_v17 }
 0x103   : > { %1716 = vmatprep.mubr.msk.f32.mxu0 %vm2362_vm3, %v2363_v8  ;;  %1915 = vmatpush3.bf16.msra.mxu0 %v1914_v32  ;;  %v1904_v32 = vpack.c.bf16 %v888_v31, %v887_v30 }
 0x104   : > { %1917 = vmatprep.subr.bf16.mxu0 %v1916_v42  ;;  %v1938_v42 = vpack.c.bf16 %v904_v40, %v903_v39  ;;  %v926_v39 = vld [vmem:[#allocation8 + $0x218] sm:$0xff]  ;;  %v1175_v40 = vld [vmem:[#allocation10 + $0x10] sm:$0xff] }
 0x106   : > { %1717 = vmatmul.mubr.f32.gmra.mrb[8].mxu0 %v2714_v38 }
 0x107   : > { %1719 = vmatprep.mubr.msk.f32.mxu0 %vm2362_vm3, %v2363_v8  ;;  %1919 = vmatpush3.bf16.msra.mxu0 %v1918_v46  ;;  %v1926_v8 = vpack.c.bf16 %v898_v2, %v897_v1  ;;  %v873_v46 = vld [vmem:[#allocation8 + $0x70] sm:$0xff] }
 0x108   : > { %1921 = vmatprep.subr.bf16.mxu0 %v1920_v55  ;;  %v923_v55 = vld [vmem:[#allocation8 + $0x200] sm:$0xff] }
 0x109   : > { %v2744_v57 = vpack.c.bf16 %v924_v56, %v923_v55 }
 0x10a   : > { %1720 = vmatmul.mubr.f32.gmra.mrb[10].mxu0 %v2722_v47  ;;  %v1888_v47 = vpack.c.bf16 %v880_v45, %v879_v44  ;;  %v890_v44 = vld [vmem:[#allocation8 + $0xf8] sm:$0xff] }
 0x10b   : > { %1923 = vmatpush3.bf16.msra.mxu0 %v1922_v59  ;;  %v1908_v45 = vpack.c.bf16 %v890_v44, %v889_v43  ;;  %v1174_v59 = vld [vmem:[#allocation10 + $0x8] sm:$0xff] }
 0x10c   : > { %1889 = vmatprep.subr.bf16.mxu1 %v1888_v47  ;;  %1925 = vmatprep.subr.bf16.mxu0 %v1924_v0  ;;  %v874_v47 = vld [vmem:[#allocation8 + $0x78] sm:$0xff] }
 0x10d   : > { %1891 = vmatpush3.bf16.msra.mxu1 %v1890_v54  ;;  %v1910_v49 = vpack.c.bf16 %v874_v47, %v873_v46  ;;  %v1942_v54 = vpack.c.bf16 %v906_v52, %v905_v51 }
 0x10e   : > { %1893 = vmatprep.subr.bf16.mxu1 %v1892_v60  ;;  %v2747_v60 = vpack.c.bf16 %v1174_v59, %v1173_v58  ;;  %v927_v59 = vld [vmem:[#allocation8 + $0x220] sm:$0xff] }
 0x10f   : > { %1927 = vmatpush3.bf16.msra.mxu0 %v1926_v8 }
 0x110   : > { %1929 = vmatprep.subr.bf16.mxu0 %v1928_v12 }
 0x111   : > { %1895 = vmatpush3.bf16.msra.mxu1 %v1894_v5 }
 0x112   : > { %1897 = vmatprep.subr.bf16.mxu1 %v1896_v9 }
 0x113   : > { %1931 = vmatpush3.bf16.msra.mxu0 %v1930_v16 }
 0x114   : > { %1933 = vmatprep.subr.bf16.mxu0 %v1932_v28 }
 0x115   : > { %1899 = vmatpush3.bf16.msra.mxu1 %v1898_v15 }
 0x116   : > { %1901 = vmatprep.subr.bf16.mxu1 %v1900_v20 }
 0x117   : > { %1935 = vmatpush3.bf16.msra.mxu0 %v1934_v29 }
 0x118   : > { %1937 = vmatprep.subr.bf16.mxu0 %v1936_v41  ;;  %v1176_v41 = vld [vmem:[#allocation10 + $0x18] sm:$0xff] }
 0x119   : > { %1903 = vmatpush3.bf16.msra.mxu1 %v1902_v24  ;;  %v808_v24 = vshrl.u32 %v807_v23, 7  ;;  %v1980_v52 = vpack.c.bf16 %v1176_v41, %v1175_v40  ;;  %v1456_v40 = vld [vmem:[%s2846_s5] ss:$0 sm:$0xff] }
 0x11a   : > { %1905 = vmatprep.subr.bf16.mxu1 %v1904_v32 }
 0x11b   : > { %1939 = vmatpush3.bf16.msra.mxu0 %v1938_v42  ;;  %v814_v25 = vadd.s32 4294967292, %v808_v24  ;;  %v810_v29 = vadd.s32 16, %v808_v24 }
 0x11c   : > { %1941 = vmatprep.subr.bf16.mxu0 %v1940_v53 }
 0x11d   : > { %1907 = vmatpush3.bf16.msra.mxu1 %v1906_v36  ;;  %vm817_vm4 = vcmp.ge.s32.totalorder %v814_v25, 0  ;;  %v2754_v35 = vadd.s32 4294967292, %v810_v29  ;;  %v925_v36 = vld [vmem:[#allocation8 + $0x210] sm:$0xff]  ;;  %v935_v25 = vld [vmem:[#allocation8 + $0x260] sm:$0xff] }
 0x11e   : > { %1909 = vmatprep.subr.bf16.mxu1 %v1908_v45  ;;  %v1948_v51 = vpack.c.bf16 %v926_v39, %v925_v36 }
 0x11f   : > { %1943 = vmatpush3.bf16.msra.mxu0 %v1942_v54  ;;  %vm822_vm5 = vcmp.lt.s32.totalorder %v2754_v35, 16 }
 0x120   : > { %1977 = vmatprep.subr.bf16.mxu0 %v2747_v60 }
 0x121   : > { %1911 = vmatpush3.bf16.msra.mxu1 %v1910_v49 }
 0x122   : > { %1945 = vmatprep.subr.bf16.mxu1 %v2744_v57 }
 0x1b5   : > { %v1500_v61 = vpop.f32.mrb[0].mxu0 }
 0x1b6   : > { %v1501_v63 = vpop.f32.mrb[1].mxu0 }
 0x1b7   : > { %v1541_v0 = vpop.f32.mrb[0].mxu1  ;;  %v1502_v1 = vadd.f32 %v1501_v63, %v1500_v61  ;;  %v928_v61 = vld [vmem:[#allocation8 + $0x228] sm:$0xff] }
 0x1b8   : > { %v1542_v2 = vpop.f32.mrb[1].mxu1 }
 0x1b9   : > { %v1543_v3 = vadd.f32 %v1542_v2, %v1541_v0  ;;  %v631_v4 = vadd.f32 %v1502_v1, %v1455_v62  ;;  %v1503_v5 = vpop.f32.mrb[2].mxu0  ;;  %v1177_v1 = vld [vmem:[#allocation10 + $0x20] sm:$0xff]  ;;  %v1178_v2 = vld [vmem:[#allocation10 + $0x28] sm:$0xff] }
 0x1ba   : > { %v1504_v6 = vpop.f32.mrb[3].mxu0 }
 0x1bb   : > { %v1544_v7 = vpop.f32.mrb[2].mxu1  ;;  %v1505_v8 = vadd.f32 %v1504_v6, %v1503_v5  ;;  %v711_v10 = vadd.f32 %v1543_v3, %v631_v4  ;;  %v1952_v6 = vpack.c.bf16 %v928_v61, %v927_v59 }
 0x1bc   : > { %v1545_v9 = vpop.f32.mrb[3].mxu1 }
 0x1bd   : > { %v1546_v11 = vadd.f32 %v1545_v9, %v1544_v7  ;;  %v636_v12 = vadd.f32 %v1505_v8, %v1455_v62  ;;  %v1506_v13 = vpop.f32.mrb[4].mxu0  ;;  %v929_v7 = vld [vmem:[#allocation8 + $0x230] sm:$0xff]  ;;  %v930_v8 = vld [vmem:[#allocation8 + $0x238] sm:$0xff]  ;;  %v1984_v9 = vpack.c.bf16 %v1178_v2, %v1177_v1 }
 0x1be   : > { %v1507_v14 = vpop.f32.mrb[5].mxu0 }
 0x1bf   : > { %v1547_v15 = vpop.f32.mrb[4].mxu1  ;;  %v1508_v16 = vadd.f32 %v1507_v14, %v1506_v13  ;;  %v716_v19 = vadd.f32 %v1546_v11, %v636_v12  ;;  %v931_v12 = vld [vmem:[#allocation8 + $0x240] sm:$0xff]  ;;  %v932_v13 = vld [vmem:[#allocation8 + $0x248] sm:$0xff] }
 0x1c0   : > { %v1548_v18 = vpop.f32.mrb[5].mxu1  ;;  %v1181_v14 = vld [vmem:[#allocation10 + $0x40] sm:$0xff] }
 0x1c1   : > { %v1549_v20 = vadd.f32 %v1548_v18, %v1547_v15  ;;  %v641_v21 = vadd.f32 %v1508_v16, %v1455_v62  ;;  %v1182_v15 = vld [vmem:[#allocation10 + $0x48] sm:$0xff]  ;;  %v1960_v16 = vpack.c.bf16 %v932_v13, %v931_v12 }
 0x1c2   : > { %v1992_v18 = vpack.c.bf16 %v1182_v15, %v1181_v14 }
 0x1c3   : > { %v721_v22 = vadd.f32 %v1549_v20, %v641_v21  ;;  %v934_v20 = vld [vmem:[#allocation8 + $0x258] sm:$0xff]  ;;  %v1183_v21 = vld [vmem:[#allocation10 + $0x50] sm:$0xff] }
 0x1d5   : > { %v790_v26 = vpop.f32.mrb[6].mxu0 }
 0x1d6   : > { %v791_v27 = vadd.f32 %v790_v26, %v711_v10  ;;  %v1715_v28 = vpop.f32.mrb[7].mxu0  ;;  %v1179_v10 = vld [vmem:[#allocation10 + $0x30] sm:$0xff]  ;;  %v936_v26 = vld [vmem:[#allocation8 + $0x268] sm:$0xff] }
 0x1d7   : > { %v1968_v28 = vpack.c.bf16 %v936_v26, %v935_v25 }
 0x1d8   : > { %v804_v30 = vmax.f32 %v791_v27, 0.0  ;;  %v1185_v27 = vld [vmem:[#allocation10 + $0x60] sm:$0xff] }
 0x1d9   : > { %v795_v31 = vpop.f32.mrb[8].mxu0 }
 0x1da   : > { %v832_v32 = vsel %vm817_vm4, %v804_v30, 0.0  ;;  %v796_v33 = vadd.f32 %v795_v31, %v716_v19  ;;  %v1718_v34 = vpop.f32.mrb[9].mxu0  ;;  %v933_v19 = vld [vmem:[#allocation8 + $0x250] sm:$0xff]  ;;  %v938_v31 = vld [vmem:[#allocation8 + $0x278] sm:$0xff] }
 0x1db   : > { %v838_v42 = vrot.slane %v832_v32, 2  ;;  %v845_v43 = vrot.slane %v832_v32, 4  ;;  %v852_v44 = vrot.slane %v832_v32, 6  ;;  %v1964_v23 = vpack.c.bf16 %v934_v20, %v933_v19  ;;  %v1187_v32 = vld [vmem:[#allocation10 + $0x70] sm:$0xff] }
 0x1dc   : > { %v805_v37 = vmax.f32 %v796_v33, 0.0  ;;  %v1188_v33 = vld [vmem:[#allocation10 + $0x78] sm:$0xff] }
 0x1dd   : > { %v800_v45 = vpop.f32.mrb[10].mxu0  ;;  %v2004_v36 = vpack.c.bf16 %v1188_v33, %v1187_v32 }
 0x1de   : > { %v2756_v46 = vadd.f32 %v800_v45, %v721_v22  ;;  %v839_v47 = vrot.slane %v805_v37, 2  ;;  %v853_v48 = vrot.slane %v805_v37, 6  ;;  %v846_v49 = vrot.slane %v805_v37, 4  ;;  %v1721_v50 = vpop.f32.mrb[11].mxu0  ;;  %v1184_v22 = vld [vmem:[#allocation10 + $0x58] sm:$0xff] }
 0x1df   : > { %v1996_v24 = vpack.c.bf16 %v1184_v22, %v1183_v21 }
 0x1e0   : > { %v806_v53 = vmax.f32 %v2756_v46, 0.0  ;;  %v840_v54 = vsel %vm444_vm0, %v838_v42, %v839_v47  ;;  %v854_v55 = vsel %vm466_vm1, %v852_v44, %v853_v48  ;;  %v847_v56 = vsel %vm455_vm2, %v845_v43, %v846_v49 }
 0x1e1   : > { %1010 = vmatprep.mubr.f32.mxu1 %v840_v54  ;;  %1085 = vmatprep.mubr.f32.mxu0 %v854_v55 }
 0x1e2   : > { %v834_v58 = vsel %vm822_vm5, %v806_v53, 0.0  ;;  %1457 = vmatmul.mubr.msk.f32.vlgmr.msra.gmra.mrb[6].mxu1 %vm817_vm4, %v804_v30  ;;  %1086 = vmatmul.mubr.f32.vlgmr.msra.gmra.mrb[12].mxu0 %v847_v56  ;;  %v937_v30 = vld [vmem:[#allocation8 + $0x270] sm:$0xff] }
 0x1e3   : > { %v841_v62 = vrot.slane %v834_v58, 2  ;;  %v848_v63 = vrot.slane %v834_v58, 4  ;;  %v855_v0 = vrot.slane %v834_v58, 6  ;;  %1947 = vmatpush3.bf16.msra.mxu1 %v2744_v57  ;;  %1979 = vmatpush3.bf16.msra.mxu0 %v2747_v60  ;;  %v1180_v57 = vld [vmem:[#allocation10 + $0x38] sm:$0xff]  ;;  %v1956_v60 = vpack.c.bf16 %v930_v8, %v929_v7 }
 0x1e4   : > { %1949 = vmatprep.subr.bf16.mxu1 %v1948_v51  ;;  %1981 = vmatprep.subr.bf16.mxu0 %v1980_v52  ;;  %v1988_v11 = vpack.c.bf16 %v1180_v57, %v1179_v10  ;;  %v1972_v34 = vpack.c.bf16 %v938_v31, %v937_v30 }
 0x1e5   : > { %v842_v3 = vsel %vm444_vm0, %v839_v47, %v841_v62  ;;  %v856_v4 = vsel %vm466_vm1, %v853_v48, %v855_v0  ;;  %v849_v5 = vsel %vm455_vm2, %v846_v49, %v848_v63 }
 0x1e6   : > { %1015 = vmatprep.mubr.f32.mxu1 %v842_v3  ;;  %1090 = vmatprep.mubr.f32.mxu0 %v856_v4 }
 0x1e7   : > { %1951 = vmatpush3.bf16.msra.mxu1 %v1948_v51  ;;  %1091 = vmatmul.mubr.f32.gmra.mrb[14].mxu0 %v849_v5 }
 0x1e8   : > { %1016 = vmatmul.mubr.f32.gmra.mrb[8].mxu1 %v805_v37  ;;  %1983 = vmatpush3.bf16.msra.mxu0 %v1980_v52 }
 0x1e9   : > { %1754 = vmatprep.mubr.f32.mxu1 %v805_v37  ;;  %1953 = vmatprep.subr.bf16.mxu1 %v1952_v6 }
 0x1ea   : > { %1985 = vmatprep.subr.bf16.mxu0 %v1984_v9  ;;  %1789 = vmatprep.mubr.f32.mxu0 %v2704_v17  ;;  %v1186_v17 = vld [vmem:[#allocation10 + $0x68] sm:$0xff] }
 0x1eb   : > { %1955 = vmatpush3.bf16.msra.mxu1 %v1952_v6  ;;  %v2000_v29 = vpack.c.bf16 %v1186_v17, %v1185_v27 }
 0x1ec   : > { %1987 = vmatpush3.bf16.msra.mxu0 %v1984_v9  ;;  %1957 = vmatprep.subr.bf16.mxu1 %v1956_v60 }
 0x1ed   : > { %1989 = vmatprep.subr.bf16.mxu0 %v1988_v11 }
 0x1ef   : > { %1959 = vmatpush3.bf16.msra.mxu1 %v1956_v60 }
 0x1f0   : > { %1991 = vmatpush3.bf16.msra.mxu0 %v1988_v11  ;;  %1961 = vmatprep.subr.bf16.mxu1 %v1960_v16 }
 0x1f1   : > { %1993 = vmatprep.subr.bf16.mxu0 %v1992_v18 }
 0x1f3   : > { %1963 = vmatpush3.bf16.msra.mxu1 %v1960_v16 }
 0x1f4   : > { %1995 = vmatpush3.bf16.msra.mxu0 %v1992_v18  ;;  %1965 = vmatprep.subr.bf16.mxu1 %v1964_v23 }
 0x1f5   : > { %1997 = vmatprep.subr.bf16.mxu0 %v1996_v24 }
 0x1f7   : > { %1967 = vmatpush3.bf16.msra.mxu1 %v1964_v23 }
 0x1f8   : > { %1999 = vmatpush3.bf16.msra.mxu0 %v1996_v24  ;;  %1969 = vmatprep.subr.bf16.mxu1 %v1968_v28 }
 0x1f9   : > { %2001 = vmatprep.subr.bf16.mxu0 %v2000_v29 }
 0x1fb   : > { %1971 = vmatpush3.bf16.msra.mxu1 %v1968_v28 }
 0x1fc   : > { %2003 = vmatpush3.bf16.msra.mxu0 %v2000_v29  ;;  %1973 = vmatprep.subr.bf16.mxu1 %v1972_v34 }
 0x1fd   : > { %2005 = vmatprep.subr.bf16.mxu0 %v2004_v36 }
 0x1ff   : > { %1975 = vmatpush3.bf16.msra.mxu1 %v1972_v34 }
 0x200   : > { %2007 = vmatpush3.bf16.msra.mxu0 %v2004_v36 }
 0x202   : > { %1755 = vmatmul.mubr.msk.f32.vlgmr.msra.gmra.mrb[10].mxu1 %vm822_vm5, %v806_v53  ;;  %v1459_v53 = vld [vmem:[%s2892_s26] ss:$0 sm:$0xff] }
 0x203   : > { %1790 = vmatmul.mubr.f32.vlgmr.msra.gmra.mrb[16].mxu0 %v2714_v38 }
 0x2b5   : > { %v1601_v37 = vpop.f32.mrb[6].mxu1  ;;  %v1639_v39 = vpop.f32.mrb[12].mxu0 }
 0x2b6   : > { %v1602_v41 = vpop.f32.mrb[7].mxu1  ;;  %v1640_v42 = vpop.f32.mrb[13].mxu0 }
 0x2b7   : > { %v1603_v43 = vadd.f32 %v1602_v41, %v1601_v37  ;;  %v1641_v44 = vadd.f32 %v1640_v42, %v1639_v39 }
 0x2b9   : > { %v1013_v45 = vadd.f32 %v1603_v43, %v1456_v40 }
 0x2ba   : > { %v1642_v47 = vpop.f32.mrb[14].mxu0 }
 0x2bb   : > { %v1604_v48 = vpop.f32.mrb[8].mxu1  ;;  %v1643_v49 = vpop.f32.mrb[15].mxu0  ;;  %v1088_v46 = vadd.f32 %v1641_v44, %v1013_v45 }
 0x2bc   : > { %v1605_v35 = vpop.f32.mrb[9].mxu1  ;;  %v1644_v50 = vadd.f32 %v1643_v49, %v1642_v47 }
 0x2bd   : > { %v1606_v51 = vadd.f32 %v1605_v35, %v1604_v48 }
 0x2bf   : > { %v1018_v38 = vadd.f32 %v1606_v51, %v1456_v40 }
 0x2c1   : > { %v1093_v52 = vadd.f32 %v1644_v50, %v1018_v38 }
 0x2d5   : > { %v1756_v54 = vpop.f32.mrb[10].mxu1 }
 0x2d6   : > { %v1168_v55 = vadd.f32 %v1756_v54, %v1093_v52  ;;  %v1162_v56 = vpop.f32.mrb[11].mxu1  ;;  %v1791_v58 = vpop.f32.mrb[16].mxu0 }
 0x2d7   : > { %v1163_v59 = vadd.f32 %v1162_v56, %v1088_v46  ;;  %v1268_v61 = vadd.f32 %v1791_v58, %v1459_v53  ;;  %v1262_v62 = vpop.f32.mrb[17].mxu0 }
 0x2d8   : > { %v1172_v63 = vmax.f32 %v1168_v55, 0.0  ;;  %v1263_v0 = vadd.f32 %v1459_v53, %v1262_v62 }
 0x2d9   : > { %v1171_v1 = vmax.f32 %v1163_v59, 0.0 }
 0x2da   : > { %v1272_v2 = vadd.f32 %v1268_v61, %v1172_v63 }
 0x2db   : > { %v1271_v3 = vadd.f32 %v1263_v0, %v1171_v1 }
 0x2dc   : > { %v1274_v4 = vmax.f32 %v1272_v2, 0.0 }
 0x2dd   : > { %v1273_v5 = vmax.f32 %v1271_v3, 0.0 }
 0x2de   : > { %1276 = vst [vmem:[%s431_s27 + $0x8] sm:$0xff] %v1274_v4 }
 0x2df   : > { %1275 = vst [vmem:[%s431_s27] sm:$0xff] %v1273_v5 }
 0x2e0   : > { %2271 = shalt.err (!%p2268_p7)
}
 0x2e1   : > { %s2272_s15 = scalar_lea.hbm %s2792_s4, 256  ;;  %s2276_s11 = scalar_lea.hbm %s2893_s0, 512 }
 0x2e2   : > { %p2273_p12 = scmp.ne.s32.totalorder %s2792_s4, %s2272_s15  ;;  %p2277_p9 = scmp.lt.u32.totalorder %s2792_s4, %s2893_s0 }
 0x2e3   : > { %p2278_p0 = scmp.lt.u32.totalorder %s2276_s11, %s2272_s15  ;;  %p2280_p4 = scmp.lt.u32.totalorder %s2272_s15, %s2792_s4 }
 0x2e4   : > { %p2274_p6 = pnand %p2273_p12, %p2568_p10 }
 0x2e5   : > { %p2279_p2 = por %p2278_p0, %p2277_p9 }
 0x2e6   : > { %p2275_p11 = pneg %p2274_p6 }
 0x2e7   : > { %p2281_p8 = por %p2280_p4, %p2279_p2 }
 0x2e9   : > { %p2282_p1 = pnand %p2281_p8, %p2275_p11 }
 0x2eb   : > { %2285 = shalt.err (!%p2282_p1)
}
 0x2ec   : > { %s2365_s21 = smov 128   ;;  %s2366_s17 = smov 8  }
 0x2ed   : > { %2024 = dma.vmem_to_hbm [thread:$0]  (%p2568_p10), %s2787_s2, 256, %s2792_s4, %s1278_s9, %s2365_s21, %s2365_s21, %s2366_s17  }
 0x2ee PF: > { %s2894_s16 = sld [smem:[#allocation17_spill]]  ;;  %s2895_s26 = sld [smem:[#allocation19_spill]] }
 0x2ef   : > { %p2897_p3 = scmp.ge.s32.totalorder %s2352_s10, 2 }
 0x2f4   : > { %s1308_s27 = sand.u32 1, %s2894_s16   ;;  %p2896_p13 = scmp.ne.s32.totalorder %s2895_s26, 0 }
 0x2f5   : > { %s1309_s25 = scalar_lea.sflag [#allocation4], %s1308_s27 }
 0x2f6   : > { %p2044_p5 = pnand %p2897_p3, %p2896_p13 }
 0x2f8   : > { %2327 = dma.done.wait (!%p2044_p5), %s1309_s25, 256  }
 0x2f9   : > { %2329 = vsyncadd (!%p2044_p5), %s1309_s25, 4294967040  ;;  %s28_s10 = sadd.s32 1, %s2352_s10   ;;  %s2898_s30 = sld [smem:[#allocation18_spill]] }
 0x2fa   : > { %p25_p7 = scmp.ge.s32.totalorder %s28_s10, 4   ;;  %s2899_s9 = sld [smem:[#allocation20_spill]] }
 0x2fb   : > { %s2900_s27 = smov %s2336_s28  ;;  %s2901_s28 = smov %s2340_s29 }
 0x2fc   : > { %s2902_s29 = smov %s2582_s12  ;;  %27 = sbr.rel (!%p25_p7) target bundleno = 16 (0x10), region = 122 }
 0x303   :  { %1314 = vsyncpa [#allocation3], 1 }
 0x304   :  { %1316 = vsyncpa [#allocation3 + $0x1], 1 }
 0x305   :  { %1317 = vsyncpa [#allocation6], 1 }
 0x306   :  { %1319 = vsyncpa [#allocation6 + $0x1], 1 }
 0x307   :  { %1320 = vsyncpa [#allocation9], 1 }
 0x308   :  { %1321 = vsyncpa [#allocation4], 1 }
 0x309   :  { %1323 = vsyncpa [#allocation4 + $0x1], 1 }

</bundles_post_ra>
